<compile_context>
chip_gen: v7x
topology: tpu7x:2x2x1
jax: 0.10.0
libtpu: 0.0.40
codegen_flags: <defaults>
</compile_context>

<pallas_src>
import numpy as np
import jax
import jax.numpy as jnp
from jax.experimental import pallas as pl
from jax.experimental.pallas import tpu as pltpu

# Mini-BERT config (bert-base is 12 layers / 768 hidden; scaled down, synthetic weights).
VOCAB = 128
HIDDEN = 32
N_LAYERS = 2           # >= 2 so the "second-to-last hidden state" is a layer output
N_HEADS = 2
HEAD_DIM = HIDDEN // N_HEADS
INTER = 64
MAX_POS = 16
TYPE_VOCAB = 2
CLS_ID = 101
SEP_ID = 102
LN_EPS = 1e-12


def _ln(x, g, b):
    mu = jnp.mean(x, axis=-1, keepdims=True)
    var = jnp.mean((x - mu) ** 2, axis=-1, keepdims=True)
    return (x - mu) * jax.lax.rsqrt(var + LN_EPS) * g + b


# ---------------- Fused BERT encoder kernel (all layers, whole batch) ----------------
def bert_encoder_kernel(x_ref, mb_ref, ge_ref, be_ref,
                        wqkv_ref, bqkv_ref, wo_ref, bo_ref,
                        g1_ref, b1_ref, w1_ref, bf1_ref,
                        w2_ref, bf2_ref, g2_ref, b2_ref,
                        penult_ref, final_ref, act_ref):
    layer = pl.program_id(0)
    n_layers = pl.num_programs(0)

    # Embedding LayerNorm folded into the first grid step.
    @pl.when(layer == 0)
    def _():
        act_ref[...] = _ln(x_ref[...], ge_ref[...], be_ref[...])

    x = act_ref[...]                       # (B*S, H) resident activation
    S = mb_ref.shape[1]
    Bn = x.shape[0] // S
    H, NH, HD = HIDDEN, N_HEADS, HEAD_DIM

    wqkv = wqkv_ref[0]
    bqkv = bqkv_ref[0]
    wo = wo_ref[0]
    bo = bo_ref[0]
    g1 = g1_ref[0]
    b1 = b1_ref[0]
    w1 = w1_ref[0]
    bf1 = bf1_ref[0]
    w2 = w2_ref[0]
    bf2 = bf2_ref[0]
    g2 = g2_ref[0]
    b2 = b2_ref[0]

    # ----- self-attention -----
    qkv = jnp.dot(x, wqkv, preferred_element_type=jnp.float32) + bqkv   # (B*S, 3H)
    mb = mb_ref[...]                                                    # (B, S) additive mask bias

    q_parts, k_parts, v_parts, m_parts = [], [], [], []
    for b in range(Bn):                      # compile-time unrolled (B, NH tiny)
        qkv_b = qkv[b * S:(b + 1) * S, :]    # (S, 3H)
        mb_b = mb[b:b + 1, :][None]          # (1, 1, S)
        for h in range(NH):
            q_parts.append(qkv_b[:, h * HD:(h + 1) * HD])
            k_parts.append(qkv_b[:, H + h * HD:H + (h + 1) * HD])
            v_parts.append(qkv_b[:, 2 * H + h * HD:2 * H + (h + 1) * HD])
            m_parts.append(mb_b)
    qh = jnp.stack(q_parts, axis=0)            # (B*NH, S, HD)
    kh = jnp.stack(k_parts, axis=0)
    vh = jnp.stack(v_parts, axis=0)
    mbias = jnp.concatenate(m_parts, axis=0)   # (B*NH, 1, S)

    scale = 1.0 / float(HEAD_DIM) ** 0.5
    s = jnp.einsum('bqd,bkd->bqk', qh, kh,
                   preferred_element_type=jnp.float32) * scale + mbias
    s = s - jnp.max(s, axis=-1, keepdims=True)
    p = jnp.exp(s)
    p = p * pl.reciprocal(jnp.sum(p, axis=-1, keepdims=True), approx=True)
    ctx_h = jnp.einsum('bqk,bkd->bqd', p, vh,
                       preferred_element_type=jnp.float32)              # (B*NH, S, HD)

    ctx = jnp.concatenate(
        [jnp.concatenate([ctx_h[b * NH + h] for h in range(NH)], axis=-1)
         for b in range(Bn)], axis=0)                                   # (B*S, H)

    attn_out = jnp.dot(ctx, wo, preferred_element_type=jnp.float32) + bo
    x1 = _ln(x + attn_out, g1, b1)

    # ----- feed forward -----
    hmid = jnp.dot(x1, w1, preferred_element_type=jnp.float32) + bf1
    # TODO(synk): BERT uses exact erf-GELU; tanh approximation kept for robust Mosaic lowering.
    hmid = jax.nn.gelu(hmid, approximate=True)
    ffn = jnp.dot(hmid, w2, preferred_element_type=jnp.float32) + bf2
    x2 = _ln(x1 + ffn, g2, b2)

    act_ref[...] = x2

    @pl.when(layer == n_layers - 2)
    def _():
        penult_ref[...] = x2     # hidden_states[-2]

    @pl.when(layer == n_layers - 1)
    def _():
        final_ref[...] = x2      # final_state


def bert_encoder_stack(x2d, mask_bias, params):
    BS, H = x2d.shape
    L = params["wqkv"].shape[0]

    def rep(shape):                       # replicated operand, full block every grid step
        return pl.BlockSpec(shape, lambda l, _n=len(shape): (0,) * _n)

    def per_layer(shape):                 # stacked per-layer operand, leading dim = layer
        return pl.BlockSpec((1,) + shape, lambda l: (l, 0, 0))

    grid_spec = pltpu.PrefetchScalarGridSpec(
        num_scalar_prefetch=0,
        grid=(L,),
        in_specs=[
            rep((BS, H)),                  # pre-LN embedding sums
            rep(tuple(mask_bias.shape)),   # (B, S) additive attention-mask bias
            rep((1, H)), rep((1, H)),      # embedding LN gamma / beta
            per_layer((H, 3 * H)), per_layer((1, 3 * H)),   # wqkv, bqkv
            per_layer((H, H)), per_layer((1, H)),           # wo, bo
            per_layer((1, H)), per_layer((1, H)),           # g1, be1
            per_layer((H, INTER)), per_layer((1, INTER)),   # w1, bf1
            per_layer((INTER, H)), per_layer((1, H)),       # w2, bf2
            per_layer((1, H)), per_layer((1, H)),           # g2, be2
        ],
        out_specs=[rep((BS, H)), rep((BS, H))],
        scratch_shapes=[pltpu.VMEM((BS, H), jnp.float32)],  # resident activation carry
    )
    penult, final = pl.pallas_call(
        bert_encoder_kernel,
        out_shape=(jax.ShapeDtypeStruct((BS, H), jnp.float32),
                   jax.ShapeDtypeStruct((BS, H), jnp.float32)),
        grid_spec=grid_spec,
        # Only the sequential layer axis remains (batch is folded into the block),
        # so "arbitrary" is the correct semantics here.
        compiler_params=pltpu.CompilerParams(dimension_semantics=("arbitrary",)),
    )(x2d, mask_bias,
      params["g_emb"], params["b_emb"],
      params["wqkv"], params["bqkv"], params["wo"], params["bo"],
      params["g1"], params["be1"], params["w1"], params["bf1"],
      params["w2"], params["bf2"], params["g2"], params["be2"])
    return penult, final


# ---------------- Parameter init (deterministic, synthetic; per-layer weights stacked) ----------------
def init_params(key):
    ks = jax.random.split(key, 3 + N_LAYERS)

    def nrm(k, shape):
        return jax.random.normal(k, shape, jnp.float32) * 0.02

    params = {
        "word_emb": nrm(ks[0], (VOCAB, HIDDEN)),
        "pos_emb": nrm(ks[1], (MAX_POS, HIDDEN)),
        "type_emb": nrm(ks[2], (TYPE_VOCAB, HIDDEN)),
        "g_emb": jnp.ones((1, HIDDEN), jnp.float32),
        "b_emb": jnp.zeros((1, HIDDEN), jnp.float32),
    }
    wqkv, wo, w1, w2 = [], [], [], []
    for l in range(N_LAYERS):
        lk = jax.random.split(ks[3 + l], 4)
        wqkv.append(nrm(lk[0], (HIDDEN, 3 * HIDDEN)))
        wo.append(nrm(lk[1], (HIDDEN, HIDDEN)))
        w1.append(nrm(lk[2], (HIDDEN, INTER)))
        w2.append(nrm(lk[3], (INTER, HIDDEN)))
    L = N_LAYERS
    params.update({
        "wqkv": jnp.stack(wqkv), "bqkv": jnp.zeros((L, 1, 3 * HIDDEN), jnp.float32),
        "wo": jnp.stack(wo), "bo": jnp.zeros((L, 1, HIDDEN), jnp.float32),
        "g1": jnp.ones((L, 1, HIDDEN), jnp.float32),
        "be1": jnp.zeros((L, 1, HIDDEN), jnp.float32),
        "w1": jnp.stack(w1), "bf1": jnp.zeros((L, 1, INTER), jnp.float32),
        "w2": jnp.stack(w2), "bf2": jnp.zeros((L, 1, HIDDEN), jnp.float32),
        "g2": jnp.ones((L, 1, HIDDEN), jnp.float32),
        "be2": jnp.zeros((L, 1, HIDDEN), jnp.float32),
    })
    return params


# ---------------- BERT forward: embeddings + single fused Pallas encoder ----------------
def bert_forward(params, input_ids, attention_mask, token_type_ids):
    B, S = input_ids.shape
    # TODO(synk): token-id embedding lookup is a data-dependent gather, kept in plain JAX.
    emb = (jnp.take(params["word_emb"], input_ids, axis=0)
           + params["pos_emb"][None, :S, :]
           + jnp.take(params["type_emb"], token_type_ids, axis=0)).astype(jnp.float32)
    x2d = emb.reshape(B * S, HIDDEN)
    mask_bias = (1.0 - attention_mask.astype(jnp.float32)) * -1e9   # (B, S)
    penult, final = bert_encoder_stack(x2d, mask_bias, params)
    return final.reshape(B, S, HIDDEN), penult.reshape(B, S, HIDDEN)


# ---------------- BERTEncoder.forward semantics (SEP-based sentence pooling) ----------------
def bert_encoder_forward(params, input_ids, attention_mask, token_type_ids,
                         pool="last", use_hidden=False):
    final_state, penult_state = bert_forward(params, input_ids, attention_mask, token_type_ids)
    out = penult_state if use_hidden else final_state                  # (B, S, H)
    # SEP positions are ragged / data-dependent: extract indices host-side once, then do a
    # single batched gather / reduce on device (same ordering as the torch per-row loop).
    ids_np = np.asarray(input_ids)
    batch_idx_np, sep_pos_np = np.nonzero(ids_np == SEP_ID)
    batch_idx = jnp.asarray(batch_idx_np, jnp.int32)
    sep_pos = jnp.asarray(sep_pos_np, jnp.int32)
    if pool == "last":
        sent_embs = out[batch_idx, sep_pos]                            # (num_sep, H)
    elif pool == "avg":
        sent_embs = jnp.mean(out, axis=1)[batch_idx]
    elif pool == "max":
        sent_embs = jnp.max(out, axis=1)[batch_idx]
    else:
        raise ValueError(f"unknown pool mode: {pool}")
    return sent_embs   # already stacked, like get_embeddings' torch.stack(emb_matrix)


if __name__ == "__main__":
    key = jax.random.PRNGKey(0)
    pkey, ikey = jax.random.split(key)
    params = init_params(pkey)

    B, S = 2, 8
    # Random word ids drawn from [1, 100) so they can never collide with CLS(101)/SEP(102).
    rand_ids = np.asarray(jax.random.randint(ikey, (B, S), 1, 100)).copy()
    rand_ids[:, 0] = CLS_ID
    rand_ids[0, 3] = SEP_ID        # two sentences in sample 0
    rand_ids[0, 7] = SEP_ID
    rand_ids[1, 7] = SEP_ID        # one sentence in sample 1
    input_ids = jnp.asarray(rand_ids, jnp.int32)
    attention_mask = jnp.ones((B, S), jnp.int32)
    token_type_ids = jnp.zeros((B, S), jnp.int32)

    n_sep = int((rand_ids == SEP_ID).sum())   # = 3 by construction

    # pool='last', use_hidden=False  (final_state, gather SEP rows)
    emb_matrix = bert_encoder_forward(params, input_ids, attention_mask, token_type_ids,
                                      pool="last", use_hidden=False)
    emb_matrix = jax.block_until_ready(emb_matrix)
    assert emb_matrix.shape == (n_sep, HIDDEN), emb_matrix.shape
    assert np.all(np.isfinite(np.asarray(emb_matrix)))

    # pool='avg', use_hidden=True  (second-to-last hidden state, mean over seq per SEP)
    emb_matrix2 = bert_encoder_forward(params, input_ids, attention_mask, token_type_ids,
                                       pool="avg", use_hidden=True)
    emb_matrix2 = jax.block_until_ready(emb_matrix2)
    assert emb_matrix2.shape == (n_sep, HIDDEN), emb_matrix2.shape

    print("KERNEL_OK")
</pallas_src>

<mosaic_0001>
module attributes {stable_mosaic.version = 11 : i64} {
  func.func @bert_encoder_kernel(%arg0: i32, %arg1: memref<16x32xf32, #tpu.memory_space<vmem>>, %arg2: memref<2x8xf32, #tpu.memory_space<vmem>>, %arg3: memref<1x32xf32, #tpu.memory_space<vmem>>, %arg4: memref<1x32xf32, #tpu.memory_space<vmem>>, %arg5: memref<1x32x96xf32, #tpu.memory_space<vmem>>, %arg6: memref<1x1x96xf32, #tpu.memory_space<vmem>>, %arg7: memref<1x32x32xf32, #tpu.memory_space<vmem>>, %arg8: memref<1x1x32xf32, #tpu.memory_space<vmem>>, %arg9: memref<1x1x32xf32, #tpu.memory_space<vmem>>, %arg10: memref<1x1x32xf32, #tpu.memory_space<vmem>>, %arg11: memref<1x32x64xf32, #tpu.memory_space<vmem>>, %arg12: memref<1x1x64xf32, #tpu.memory_space<vmem>>, %arg13: memref<1x64x32xf32, #tpu.memory_space<vmem>>, %arg14: memref<1x1x32xf32, #tpu.memory_space<vmem>>, %arg15: memref<1x1x32xf32, #tpu.memory_space<vmem>>, %arg16: memref<1x1x32xf32, #tpu.memory_space<vmem>>, %arg17: memref<16x32xf32, #tpu.memory_space<vmem>>, %arg18: memref<16x32xf32, #tpu.memory_space<vmem>>, %arg19: memref<16x32xf32, #tpu.memory_space<vmem>>) attributes {dimension_semantics = [#tpu.dimension_semantics<arbitrary>], iteration_bounds = array<i64: 2>, scalar_prefetch = 0 : i64, scratch_operands = 1 : i64, tpu.core_type = #tpu.core_type<tc>, window_params = [{pipeline_mode = #tpu.pipeline_mode<synchronous>, transform_indices = @transform_0, window_bounds = array<i64: 16, 32>}, {pipeline_mode = #tpu.pipeline_mode<synchronous>, transform_indices = @transform_1, window_bounds = array<i64: 2, 8>}, {pipeline_mode = #tpu.pipeline_mode<synchronous>, transform_indices = @transform_2, window_bounds = array<i64: 1, 32>}, {pipeline_mode = #tpu.pipeline_mode<synchronous>, transform_indices = @transform_3, window_bounds = array<i64: 1, 32>}, {transform_indices = @transform_4, window_bounds = array<i64: 1, 32, 96>}, {transform_indices = @transform_5, window_bounds = array<i64: 1, 1, 96>}, {transform_indices = @transform_6, window_bounds = array<i64: 1, 32, 32>}, {transform_indices = @transform_7, window_bounds = array<i64: 1, 1, 32>}, {transform_indices = @transform_8, window_bounds = array<i64: 1, 1, 32>}, {transform_indices = @transform_9, window_bounds = array<i64: 1, 1, 32>}, {transform_indices = @transform_10, window_bounds = array<i64: 1, 32, 64>}, {transform_indices = @transform_11, window_bounds = array<i64: 1, 1, 64>}, {transform_indices = @transform_12, window_bounds = array<i64: 1, 64, 32>}, {transform_indices = @transform_13, window_bounds = array<i64: 1, 1, 32>}, {transform_indices = @transform_14, window_bounds = array<i64: 1, 1, 32>}, {transform_indices = @transform_15, window_bounds = array<i64: 1, 1, 32>}, {pipeline_mode = #tpu.pipeline_mode<synchronous>, transform_indices = @transform_16, window_bounds = array<i64: 16, 32>}, {pipeline_mode = #tpu.pipeline_mode<synchronous>, transform_indices = @transform_17, window_bounds = array<i64: 16, 32>}]} {
    %c0_i32 = arith.constant 0 : i32
    %0 = arith.cmpi eq, %arg0, %c0_i32 : i32
    %1 = arith.extui %0 : i1 to i32
    %c0_i32_0 = arith.constant 0 : i32
    %2 = arith.cmpi ne, %1, %c0_i32_0 : i32
    scf.if %2 {
      %c0_67 = arith.constant 0 : index
      %c0_68 = arith.constant 0 : index
      %168 = vector.load %arg1[%c0_67, %c0_68] : memref<16x32xf32, #tpu.memory_space<vmem>>, vector<16x32xf32>
      %c0_69 = arith.constant 0 : index
      %c0_70 = arith.constant 0 : index
      %169 = vector.load %arg3[%c0_69, %c0_70] : memref<1x32xf32, #tpu.memory_space<vmem>>, vector<1x32xf32>
      %c0_71 = arith.constant 0 : index
      %c0_72 = arith.constant 0 : index
      %170 = vector.load %arg4[%c0_71, %c0_72] : memref<1x32xf32, #tpu.memory_space<vmem>>, vector<1x32xf32>
      %cst_73 = arith.constant dense<0.000000e+00> : vector<16xf32>
      %171 = vector.multi_reduction <add>, %168, %cst_73 [1] : vector<16x32xf32> to vector<16xf32>
      %172 = vector.shape_cast %171 : vector<16xf32> to vector<16x1xf32>
      %cst_74 = arith.constant 3.200000e+01 : f32
      %173 = vector.broadcast %cst_74 : f32 to vector<16x1xf32>
      %174 = arith.divf %172, %173 : vector<16x1xf32>
      %175 = vector.broadcast %174 : vector<16x1xf32> to vector<16x32xf32>
      %176 = arith.subf %168, %175 : vector<16x32xf32>
      %177 = arith.mulf %176, %176 : vector<16x32xf32>
      %cst_75 = arith.constant dense<0.000000e+00> : vector<16xf32>
      %178 = vector.multi_reduction <add>, %177, %cst_75 [1] : vector<16x32xf32> to vector<16xf32>
      %179 = vector.shape_cast %178 : vector<16xf32> to vector<16x1xf32>
      %cst_76 = arith.constant 3.200000e+01 : f32
      %180 = vector.broadcast %cst_76 : f32 to vector<16x1xf32>
      %181 = arith.divf %179, %180 : vector<16x1xf32>
      %182 = vector.broadcast %174 : vector<16x1xf32> to vector<16x32xf32>
      %183 = arith.subf %168, %182 : vector<16x32xf32>
      %cst_77 = arith.constant 9.99999996E-13 : f32
      %184 = vector.broadcast %cst_77 : f32 to vector<16x1xf32>
      %185 = arith.addf %181, %184 : vector<16x1xf32>
      %186 = math.rsqrt %185 : vector<16x1xf32>
      %187 = vector.broadcast %186 : vector<16x1xf32> to vector<16x32xf32>
      %188 = arith.mulf %183, %187 : vector<16x32xf32>
      %189 = vector.broadcast %169 : vector<1x32xf32> to vector<16x32xf32>
      %190 = arith.mulf %188, %189 : vector<16x32xf32>
      %191 = vector.broadcast %170 : vector<1x32xf32> to vector<16x32xf32>
      %192 = arith.addf %190, %191 : vector<16x32xf32>
      %c0_78 = arith.constant 0 : index
      %c0_79 = arith.constant 0 : index
      %193 = vector.load %arg19[%c0_78, %c0_79] : memref<16x32xf32, #tpu.memory_space<vmem>>, vector<16x32xf32>
      tpu.vector_store %arg19[%c0_78, %c0_79], %192 {strides = array<i32>} : memref<16x32xf32, #tpu.memory_space<vmem>>, vector<16x32xf32>,
    } else {
    }
    %c0 = arith.constant 0 : index
    %c0_1 = arith.constant 0 : index
    %3 = vector.load %arg19[%c0, %c0_1] : memref<16x32xf32, #tpu.memory_space<vmem>>, vector<16x32xf32>
    %c0_2 = arith.constant 0 : index
    %c0_3 = arith.constant 0 : index
    %c0_4 = arith.constant 0 : index
    %4 = vector.load %arg5[%c0_2, %c0_3, %c0_4] : memref<1x32x96xf32, #tpu.memory_space<vmem>>, vector<1x32x96xf32>
    %5 = vector.shape_cast %4 : vector<1x32x96xf32> to vector<32x96xf32>
    %c0_5 = arith.constant 0 : index
    %c0_6 = arith.constant 0 : index
    %c0_7 = arith.constant 0 : index
    %6 = vector.load %arg6[%c0_5, %c0_6, %c0_7] : memref<1x1x96xf32, #tpu.memory_space<vmem>>, vector<1x1x96xf32>
    %7 = vector.shape_cast %6 : vector<1x1x96xf32> to vector<1x96xf32>
    %c0_8 = arith.constant 0 : index
    %c0_9 = arith.constant 0 : index
    %c0_10 = arith.constant 0 : index
    %8 = vector.load %arg7[%c0_8, %c0_9, %c0_10] : memref<1x32x32xf32, #tpu.memory_space<vmem>>, vector<1x32x32xf32>
    %9 = vector.shape_cast %8 : vector<1x32x32xf32> to vector<32x32xf32>
    %c0_11 = arith.constant 0 : index
    %c0_12 = arith.constant 0 : index
    %c0_13 = arith.constant 0 : index
    %10 = vector.load %arg8[%c0_11, %c0_12, %c0_13] : memref<1x1x32xf32, #tpu.memory_space<vmem>>, vector<1x1x32xf32>
    %11 = vector.shape_cast %10 : vector<1x1x32xf32> to vector<1x32xf32>
    %c0_14 = arith.constant 0 : index
    %c0_15 = arith.constant 0 : index
    %c0_16 = arith.constant 0 : index
    %12 = vector.load %arg9[%c0_14, %c0_15, %c0_16] : memref<1x1x32xf32, #tpu.memory_space<vmem>>, vector<1x1x32xf32>
    %13 = vector.shape_cast %12 : vector<1x1x32xf32> to vector<1x32xf32>
    %c0_17 = arith.constant 0 : index
    %c0_18 = arith.constant 0 : index
    %c0_19 = arith.constant 0 : index
    %14 = vector.load %arg10[%c0_17, %c0_18, %c0_19] : memref<1x1x32xf32, #tpu.memory_space<vmem>>, vector<1x1x32xf32>
    %15 = vector.shape_cast %14 : vector<1x1x32xf32> to vector<1x32xf32>
    %c0_20 = arith.constant 0 : index
    %c0_21 = arith.constant 0 : index
    %c0_22 = arith.constant 0 : index
    %16 = vector.load %arg11[%c0_20, %c0_21, %c0_22] : memref<1x32x64xf32, #tpu.memory_space<vmem>>, vector<1x32x64xf32>
    %17 = vector.shape_cast %16 : vector<1x32x64xf32> to vector<32x64xf32>
    %c0_23 = arith.constant 0 : index
    %c0_24 = arith.constant 0 : index
    %c0_25 = arith.constant 0 : index
    %18 = vector.load %arg12[%c0_23, %c0_24, %c0_25] : memref<1x1x64xf32, #tpu.memory_space<vmem>>, vector<1x1x64xf32>
    %19 = vector.shape_cast %18 : vector<1x1x64xf32> to vector<1x64xf32>
    %c0_26 = arith.constant 0 : index
    %c0_27 = arith.constant 0 : index
    %c0_28 = arith.constant 0 : index
    %20 = vector.load %arg13[%c0_26, %c0_27, %c0_28] : memref<1x64x32xf32, #tpu.memory_space<vmem>>, vector<1x64x32xf32>
    %21 = vector.shape_cast %20 : vector<1x64x32xf32> to vector<64x32xf32>
    %c0_29 = arith.constant 0 : index
    %c0_30 = arith.constant 0 : index
    %c0_31 = arith.constant 0 : index
    %22 = vector.load %arg14[%c0_29, %c0_30, %c0_31] : memref<1x1x32xf32, #tpu.memory_space<vmem>>, vector<1x1x32xf32>
    %23 = vector.shape_cast %22 : vector<1x1x32xf32> to vector<1x32xf32>
    %c0_32 = arith.constant 0 : index
    %c0_33 = arith.constant 0 : index
    %c0_34 = arith.constant 0 : index
    %24 = vector.load %arg15[%c0_32, %c0_33, %c0_34] : memref<1x1x32xf32, #tpu.memory_space<vmem>>, vector<1x1x32xf32>
    %25 = vector.shape_cast %24 : vector<1x1x32xf32> to vector<1x32xf32>
    %c0_35 = arith.constant 0 : index
    %c0_36 = arith.constant 0 : index
    %c0_37 = arith.constant 0 : index
    %26 = vector.load %arg16[%c0_35, %c0_36, %c0_37] : memref<1x1x32xf32, #tpu.memory_space<vmem>>, vector<1x1x32xf32>
    %27 = vector.shape_cast %26 : vector<1x1x32xf32> to vector<1x32xf32>
    %cst = arith.constant dense<0.000000e+00> : vector<16x96xf32>
    %28 = tpu.matmul %3, %5, %cst {dimension_numbers = #tpu.dot_dimension_numbers<[1], [0], [0], [1], [0, 0, 1, 1], [], []>} : vector<16x32xf32>, vector<32x96xf32>, vector<16x96xf32> -> vector<16x96xf32>
    %29 = vector.broadcast %7 : vector<1x96xf32> to vector<16x96xf32>
    %30 = arith.addf %28, %29 : vector<16x96xf32>
    %c0_38 = arith.constant 0 : index
    %c0_39 = arith.constant 0 : index
    %31 = vector.load %arg2[%c0_38, %c0_39] : memref<2x8xf32, #tpu.memory_space<vmem>>, vector<2x8xf32>
    %32 = vector.extract_strided_slice %30 {offsets = [0, 0], sizes = [8, 96], strides = [1, 1]} : vector<16x96xf32> to vector<8x96xf32>
    %33 = vector.extract_strided_slice %31 {offsets = [0, 0], sizes = [1, 8], strides = [1, 1]} : vector<2x8xf32> to vector<1x8xf32>
    %34 = vector.shape_cast %33 : vector<1x8xf32> to vector<1x1x8xf32>
    %35 = vector.extract_strided_slice %32 {offsets = [0, 0], sizes = [8, 16], strides = [1, 1]} : vector<8x96xf32> to vector<8x16xf32>
    %36 = vector.extract_strided_slice %32 {offsets = [0, 32], sizes = [8, 16], strides = [1, 1]} : vector<8x96xf32> to vector<8x16xf32>
    %37 = vector.extract_strided_slice %32 {offsets = [0, 64], sizes = [8, 16], strides = [1, 1]} : vector<8x96xf32> to vector<8x16xf32>
    %38 = vector.extract_strided_slice %32 {offsets = [0, 16], sizes = [8, 16], strides = [1, 1]} : vector<8x96xf32> to vector<8x16xf32>
    %39 = vector.extract_strided_slice %32 {offsets = [0, 48], sizes = [8, 16], strides = [1, 1]} : vector<8x96xf32> to vector<8x16xf32>
    %40 = vector.extract_strided_slice %32 {offsets = [0, 80], sizes = [8, 16], strides = [1, 1]} : vector<8x96xf32> to vector<8x16xf32>
    %41 = vector.extract_strided_slice %30 {offsets = [8, 0], sizes = [8, 96], strides = [1, 1]} : vector<16x96xf32> to vector<8x96xf32>
    %42 = vector.extract_strided_slice %31 {offsets = [1, 0], sizes = [1, 8], strides = [1, 1]} : vector<2x8xf32> to vector<1x8xf32>
    %43 = vector.shape_cast %42 : vector<1x8xf32> to vector<1x1x8xf32>
    %44 = vector.extract_strided_slice %41 {offsets = [0, 0], sizes = [8, 16], strides = [1, 1]} : vector<8x96xf32> to vector<8x16xf32>
    %45 = vector.extract_strided_slice %41 {offsets = [0, 32], sizes = [8, 16], strides = [1, 1]} : vector<8x96xf32> to vector<8x16xf32>
    %46 = vector.extract_strided_slice %41 {offsets = [0, 64], sizes = [8, 16], strides = [1, 1]} : vector<8x96xf32> to vector<8x16xf32>
    %47 = vector.extract_strided_slice %41 {offsets = [0, 16], sizes = [8, 16], strides = [1, 1]} : vector<8x96xf32> to vector<8x16xf32>
    %48 = vector.extract_strided_slice %41 {offsets = [0, 48], sizes = [8, 16], strides = [1, 1]} : vector<8x96xf32> to vector<8x16xf32>
    %49 = vector.extract_strided_slice %41 {offsets = [0, 80], sizes = [8, 16], strides = [1, 1]} : vector<8x96xf32> to vector<8x16xf32>
    %50 = vector.shape_cast %35 : vector<8x16xf32> to vector<1x8x16xf32>
    %51 = vector.shape_cast %38 : vector<8x16xf32> to vector<1x8x16xf32>
    %52 = vector.shape_cast %44 : vector<8x16xf32> to vector<1x8x16xf32>
    %53 = vector.shape_cast %47 : vector<8x16xf32> to vector<1x8x16xf32>
    %54 = tpu.concatenate %50, %51, %52, %53 in 0 : vector<1x8x16xf32>, vector<1x8x16xf32>, vector<1x8x16xf32>, vector<1x8x16xf32> -> vector<4x8x16xf32>
    %55 = vector.shape_cast %36 : vector<8x16xf32> to vector<1x8x16xf32>
    %56 = vector.shape_cast %39 : vector<8x16xf32> to vector<1x8x16xf32>
    %57 = vector.shape_cast %45 : vector<8x16xf32> to vector<1x8x16xf32>
    %58 = vector.shape_cast %48 : vector<8x16xf32> to vector<1x8x16xf32>
    %59 = tpu.concatenate %55, %56, %57, %58 in 0 : vector<1x8x16xf32>, vector<1x8x16xf32>, vector<1x8x16xf32>, vector<1x8x16xf32> -> vector<4x8x16xf32>
    %60 = vector.shape_cast %37 : vector<8x16xf32> to vector<1x8x16xf32>
    %61 = vector.shape_cast %40 : vector<8x16xf32> to vector<1x8x16xf32>
    %62 = vector.shape_cast %46 : vector<8x16xf32> to vector<1x8x16xf32>
    %63 = vector.shape_cast %49 : vector<8x16xf32> to vector<1x8x16xf32>
    %64 = tpu.concatenate %60, %61, %62, %63 in 0 : vector<1x8x16xf32>, vector<1x8x16xf32>, vector<1x8x16xf32>, vector<1x8x16xf32> -> vector<4x8x16xf32>
    %65 = tpu.concatenate %34, %34, %43, %43 in 0 : vector<1x1x8xf32>, vector<1x1x8xf32>, vector<1x1x8xf32>, vector<1x1x8xf32> -> vector<4x1x8xf32>
    "tpu.trace_start"() <{level = 10 : i32, message = "bqd,bkd->bqk"}> : () -> ()
    %cst_40 = arith.constant dense<0.000000e+00> : vector<4x8x8xf32>
    %66 = tpu.matmul %54, %59, %cst_40 {dimension_numbers = #tpu.dot_dimension_numbers<[2], [2], [1], [1], [0, 0, 0, 1, 1, 1], [0], [0]>} : vector<4x8x16xf32>, vector<4x8x16xf32>, vector<4x8x8xf32> -> vector<4x8x8xf32>
    "tpu.trace_stop"() : () -> ()
    %cst_41 = arith.constant 2.500000e-01 : f32
    %67 = vector.broadcast %cst_41 : f32 to vector<4x8x8xf32>
    %68 = arith.mulf %66, %67 : vector<4x8x8xf32>
    %69 = vector.broadcast %65 : vector<4x1x8xf32> to vector<4x8x8xf32>
    %70 = arith.addf %68, %69 : vector<4x8x8xf32>
    %cst_42 = arith.constant dense<0xFF800000> : vector<4x8xf32>
    %71 = vector.multi_reduction <maximumf>, %70, %cst_42 [2] : vector<4x8x8xf32> to vector<4x8xf32>
    %72 = vector.shape_cast %71 : vector<4x8xf32> to vector<4x8x1xf32>
    %73 = vector.broadcast %72 : vector<4x8x1xf32> to vector<4x8x8xf32>
    %74 = arith.subf %70, %73 : vector<4x8x8xf32>
    %75 = math.exp %74 : vector<4x8x8xf32>
    %cst_43 = arith.constant dense<0.000000e+00> : vector<4x8xf32>
    %76 = vector.multi_reduction <add>, %75, %cst_43 [2] : vector<4x8x8xf32> to vector<4x8xf32>
    %77 = vector.shape_cast %76 : vector<4x8xf32> to vector<4x8x1xf32>
    %78 = tpu.reciprocal %77 {approx = true} : vector<4x8x1xf32> -> vector<4x8x1xf32>
    %79 = vector.broadcast %78 : vector<4x8x1xf32> to vector<4x8x8xf32>
    %80 = arith.mulf %75, %79 : vector<4x8x8xf32>
    "tpu.trace_start"() <{level = 10 : i32, message = "bqk,bkd->bqd"}> : () -> ()
    %cst_44 = arith.constant dense<0.000000e+00> : vector<4x8x16xf32>
    %81 = tpu.matmul %80, %64, %cst_44 {dimension_numbers = #tpu.dot_dimension_numbers<[2], [1], [1], [2], [0, 0, 0, 1, 1, 2], [0], [0]>} : vector<4x8x8xf32>, vector<4x8x16xf32>, vector<4x8x16xf32> -> vector<4x8x16xf32>
    "tpu.trace_stop"() : () -> ()
    %82 = vector.extract_strided_slice %81 {offsets = [0, 0, 0], sizes = [1, 8, 16], strides = [1, 1, 1]} : vector<4x8x16xf32> to vector<1x8x16xf32>
    %83 = vector.shape_cast %82 : vector<1x8x16xf32> to vector<8x16xf32>
    %84 = vector.extract_strided_slice %81 {offsets = [1, 0, 0], sizes = [1, 8, 16], strides = [1, 1, 1]} : vector<4x8x16xf32> to vector<1x8x16xf32>
    %85 = vector.shape_cast %84 : vector<1x8x16xf32> to vector<8x16xf32>
    %86 = tpu.concatenate %83, %85 in 1 : vector<8x16xf32>, vector<8x16xf32> -> vector<8x32xf32>
    %87 = vector.extract_strided_slice %81 {offsets = [2, 0, 0], sizes = [1, 8, 16], strides = [1, 1, 1]} : vector<4x8x16xf32> to vector<1x8x16xf32>
    %88 = vector.shape_cast %87 : vector<1x8x16xf32> to vector<8x16xf32>
    %89 = vector.extract_strided_slice %81 {offsets = [3, 0, 0], sizes = [1, 8, 16], strides = [1, 1, 1]} : vector<4x8x16xf32> to vector<1x8x16xf32>
    %90 = vector.shape_cast %89 : vector<1x8x16xf32> to vector<8x16xf32>
    %91 = tpu.concatenate %88, %90 in 1 : vector<8x16xf32>, vector<8x16xf32> -> vector<8x32xf32>
    %92 = tpu.concatenate %86, %91 in 0 : vector<8x32xf32>, vector<8x32xf32> -> vector<16x32xf32>
    %cst_45 = arith.constant dense<0.000000e+00> : vector<16x32xf32>
    %93 = tpu.matmul %92, %9, %cst_45 {dimension_numbers = #tpu.dot_dimension_numbers<[1], [0], [0], [1], [0, 0, 1, 1], [], []>} : vector<16x32xf32>, vector<32x32xf32>, vector<16x32xf32> -> vector<16x32xf32>
    %94 = vector.broadcast %11 : vector<1x32xf32> to vector<16x32xf32>
    %95 = arith.addf %93, %94 : vector<16x32xf32>
    %96 = arith.addf %3, %95 : vector<16x32xf32>
    %cst_46 = arith.constant dense<0.000000e+00> : vector<16xf32>
    %97 = vector.multi_reduction <add>, %96, %cst_46 [1] : vector<16x32xf32> to vector<16xf32>
    %98 = vector.shape_cast %97 : vector<16xf32> to vector<16x1xf32>
    %cst_47 = arith.constant 3.200000e+01 : f32
    %99 = vector.broadcast %cst_47 : f32 to vector<16x1xf32>
    %100 = arith.divf %98, %99 : vector<16x1xf32>
    %101 = vector.broadcast %100 : vector<16x1xf32> to vector<16x32xf32>
    %102 = arith.subf %96, %101 : vector<16x32xf32>
    %103 = arith.mulf %102, %102 : vector<16x32xf32>
    %cst_48 = arith.constant dense<0.000000e+00> : vector<16xf32>
    %104 = vector.multi_reduction <add>, %103, %cst_48 [1] : vector<16x32xf32> to vector<16xf32>
    %105 = vector.shape_cast %104 : vector<16xf32> to vector<16x1xf32>
    %cst_49 = arith.constant 3.200000e+01 : f32
    %106 = vector.broadcast %cst_49 : f32 to vector<16x1xf32>
    %107 = arith.divf %105, %106 : vector<16x1xf32>
    %108 = vector.broadcast %100 : vector<16x1xf32> to vector<16x32xf32>
    %109 = arith.subf %96, %108 : vector<16x32xf32>
    %cst_50 = arith.constant 9.99999996E-13 : f32
    %110 = vector.broadcast %cst_50 : f32 to vector<16x1xf32>
    %111 = arith.addf %107, %110 : vector<16x1xf32>
    %112 = math.rsqrt %111 : vector<16x1xf32>
    %113 = vector.broadcast %112 : vector<16x1xf32> to vector<16x32xf32>
    %114 = arith.mulf %109, %113 : vector<16x32xf32>
    %115 = vector.broadcast %13 : vector<1x32xf32> to vector<16x32xf32>
    %116 = arith.mulf %114, %115 : vector<16x32xf32>
    %117 = vector.broadcast %15 : vector<1x32xf32> to vector<16x32xf32>
    %118 = arith.addf %116, %117 : vector<16x32xf32>
    %cst_51 = arith.constant dense<0.000000e+00> : vector<16x64xf32>
    %119 = tpu.matmul %118, %17, %cst_51 {dimension_numbers = #tpu.dot_dimension_numbers<[1], [0], [0], [1], [0, 0, 1, 1], [], []>} : vector<16x32xf32>, vector<32x64xf32>, vector<16x64xf32> -> vector<16x64xf32>
    %120 = vector.broadcast %19 : vector<1x64xf32> to vector<16x64xf32>
    %121 = arith.addf %119, %120 : vector<16x64xf32>
    %122 = arith.mulf %121, %121 : vector<16x64xf32>
    %123 = arith.mulf %121, %122 : vector<16x64xf32>
    %cst_52 = arith.constant 4.471500e-02 : f32
    %124 = vector.broadcast %cst_52 : f32 to vector<16x64xf32>
    %125 = arith.mulf %124, %123 : vector<16x64xf32>
    %126 = arith.addf %121, %125 : vector<16x64xf32>
    %cst_53 = arith.constant 0.797884583 : f32
    %127 = vector.broadcast %cst_53 : f32 to vector<16x64xf32>
    %128 = arith.mulf %127, %126 : vector<16x64xf32>
    %129 = math.tanh %128 : vector<16x64xf32>
    %cst_54 = arith.constant 1.000000e+00 : f32
    %130 = vector.broadcast %cst_54 : f32 to vector<16x64xf32>
    %131 = arith.addf %130, %129 : vector<16x64xf32>
    %cst_55 = arith.constant 5.000000e-01 : f32
    %132 = vector.broadcast %cst_55 : f32 to vector<16x64xf32>
    %133 = arith.mulf %132, %131 : vector<16x64xf32>
    %134 = arith.mulf %121, %133 : vector<16x64xf32>
    %cst_56 = arith.constant dense<0.000000e+00> : vector<16x32xf32>
    %135 = tpu.matmul %134, %21, %cst_56 {dimension_numbers = #tpu.dot_dimension_numbers<[1], [0], [0], [1], [0, 0, 1, 1], [], []>} : vector<16x64xf32>, vector<64x32xf32>, vector<16x32xf32> -> vector<16x32xf32>
    %136 = vector.broadcast %23 : vector<1x32xf32> to vector<16x32xf32>
    %137 = arith.addf %135, %136 : vector<16x32xf32>
    %138 = arith.addf %118, %137 : vector<16x32xf32>
    %cst_57 = arith.constant dense<0.000000e+00> : vector<16xf32>
    %139 = vector.multi_reduction <add>, %138, %cst_57 [1] : vector<16x32xf32> to vector<16xf32>
    %140 = vector.shape_cast %139 : vector<16xf32> to vector<16x1xf32>
    %cst_58 = arith.constant 3.200000e+01 : f32
    %141 = vector.broadcast %cst_58 : f32 to vector<16x1xf32>
    %142 = arith.divf %140, %141 : vector<16x1xf32>
    %143 = vector.broadcast %142 : vector<16x1xf32> to vector<16x32xf32>
    %144 = arith.subf %138, %143 : vector<16x32xf32>
    %145 = arith.mulf %144, %144 : vector<16x32xf32>
    %cst_59 = arith.constant dense<0.000000e+00> : vector<16xf32>
    %146 = vector.multi_reduction <add>, %145, %cst_59 [1] : vector<16x32xf32> to vector<16xf32>
    %147 = vector.shape_cast %146 : vector<16xf32> to vector<16x1xf32>
    %cst_60 = arith.constant 3.200000e+01 : f32
    %148 = vector.broadcast %cst_60 : f32 to vector<16x1xf32>
    %149 = arith.divf %147, %148 : vector<16x1xf32>
    %150 = vector.broadcast %142 : vector<16x1xf32> to vector<16x32xf32>
    %151 = arith.subf %138, %150 : vector<16x32xf32>
    %cst_61 = arith.constant 9.99999996E-13 : f32
    %152 = vector.broadcast %cst_61 : f32 to vector<16x1xf32>
    %153 = arith.addf %149, %152 : vector<16x1xf32>
    %154 = math.rsqrt %153 : vector<16x1xf32>
    %155 = vector.broadcast %154 : vector<16x1xf32> to vector<16x32xf32>
    %156 = arith.mulf %151, %155 : vector<16x32xf32>
    %157 = vector.broadcast %25 : vector<1x32xf32> to vector<16x32xf32>
    %158 = arith.mulf %156, %157 : vector<16x32xf32>
    %159 = vector.broadcast %27 : vector<1x32xf32> to vector<16x32xf32>
    %160 = arith.addf %158, %159 : vector<16x32xf32>
    %c0_62 = arith.constant 0 : index
    %c0_63 = arith.constant 0 : index
    %161 = vector.load %arg19[%c0_62, %c0_63] : memref<16x32xf32, #tpu.memory_space<vmem>>, vector<16x32xf32>
    tpu.vector_store %arg19[%c0_62, %c0_63], %160 {strides = array<i32>} : memref<16x32xf32, #tpu.memory_space<vmem>>, vector<16x32xf32>,
    %c0_i32_64 = arith.constant 0 : i32
    %162 = arith.cmpi eq, %arg0, %c0_i32_64 : i32
    %163 = arith.extui %162 : i1 to i32
    %c0_i32_65 = arith.constant 0 : i32
    %164 = arith.cmpi ne, %163, %c0_i32_65 : i32
    scf.if %164 {
      %c0_67 = arith.constant 0 : index
      %c0_68 = arith.constant 0 : index
      %168 = vector.load %arg17[%c0_67, %c0_68] : memref<16x32xf32, #tpu.memory_space<vmem>>, vector<16x32xf32>
      tpu.vector_store %arg17[%c0_67, %c0_68], %160 {strides = array<i32>} : memref<16x32xf32, #tpu.memory_space<vmem>>, vector<16x32xf32>,
    } else {
    }
    %c1_i32 = arith.constant 1 : i32
    %165 = arith.cmpi eq, %arg0, %c1_i32 : i32
    %166 = arith.extui %165 : i1 to i32
    %c0_i32_66 = arith.constant 0 : i32
    %167 = arith.cmpi ne, %166, %c0_i32_66 : i32
    scf.if %167 {
      %c0_67 = arith.constant 0 : index
      %c0_68 = arith.constant 0 : index
      %168 = vector.load %arg18[%c0_67, %c0_68] : memref<16x32xf32, #tpu.memory_space<vmem>>, vector<16x32xf32>
      tpu.vector_store %arg18[%c0_67, %c0_68], %160 {strides = array<i32>} : memref<16x32xf32, #tpu.memory_space<vmem>>, vector<16x32xf32>,
    } else {
    }
    return
  }
  func.func @transform_0(%arg0: i32) -> (i32, i32) {
    %c0_i32 = arith.constant 0 : i32
    %c0_i32_0 = arith.constant 0 : i32
    %c0_i32_1 = arith.constant 0 : i32
    return %c0_i32, %c0_i32_0 : i32, i32
  }
  func.func @transform_1(%arg0: i32) -> (i32, i32) {
    %c0_i32 = arith.constant 0 : i32
    %c0_i32_0 = arith.constant 0 : i32
    %c0_i32_1 = arith.constant 0 : i32
    return %c0_i32, %c0_i32_0 : i32, i32
  }
  func.func @transform_2(%arg0: i32) -> (i32, i32) {
    %c0_i32 = arith.constant 0 : i32
    %c0_i32_0 = arith.constant 0 : i32
    %c0_i32_1 = arith.constant 0 : i32
    return %c0_i32, %c0_i32_0 : i32, i32
  }
  func.func @transform_3(%arg0: i32) -> (i32, i32) {
    %c0_i32 = arith.constant 0 : i32
    %c0_i32_0 = arith.constant 0 : i32
    %c0_i32_1 = arith.constant 0 : i32
    return %c0_i32, %c0_i32_0 : i32, i32
  }
  func.func @transform_4(%arg0: i32) -> (i32, i32, i32) {
    %c0_i32 = arith.constant 0 : i32
    %c0_i32_0 = arith.constant 0 : i32
    %c0_i32_1 = arith.constant 0 : i32
    return %arg0, %c0_i32, %c0_i32_0 : i32, i32, i32
  }
  func.func @transform_5(%arg0: i32) -> (i32, i32, i32) {
    %c0_i32 = arith.constant 0 : i32
    %c0_i32_0 = arith.constant 0 : i32
    %c0_i32_1 = arith.constant 0 : i32
    return %arg0, %c0_i32, %c0_i32_0 : i32, i32, i32
  }
  func.func @transform_6(%arg0: i32) -> (i32, i32, i32) {
    %c0_i32 = arith.constant 0 : i32
    %c0_i32_0 = arith.constant 0 : i32
    %c0_i32_1 = arith.constant 0 : i32
    return %arg0, %c0_i32, %c0_i32_0 : i32, i32, i32
  }
  func.func @transform_7(%arg0: i32) -> (i32, i32, i32) {
    %c0_i32 = arith.constant 0 : i32
    %c0_i32_0 = arith.constant 0 : i32
    %c0_i32_1 = arith.constant 0 : i32
    return %arg0, %c0_i32, %c0_i32_0 : i32, i32, i32
  }
  func.func @transform_8(%arg0: i32) -> (i32, i32, i32) {
    %c0_i32 = arith.constant 0 : i32
    %c0_i32_0 = arith.constant 0 : i32
    %c0_i32_1 = arith.constant 0 : i32
    return %arg0, %c0_i32, %c0_i32_0 : i32, i32, i32
  }
  func.func @transform_9(%arg0: i32) -> (i32, i32, i32) {
    %c0_i32 = arith.constant 0 : i32
    %c0_i32_0 = arith.constant 0 : i32
    %c0_i32_1 = arith.constant 0 : i32
    return %arg0, %c0_i32, %c0_i32_0 : i32, i32, i32
  }
  func.func @transform_10(%arg0: i32) -> (i32, i32, i32) {
    %c0_i32 = arith.constant 0 : i32
    %c0_i32_0 = arith.constant 0 : i32
    %c0_i32_1 = arith.constant 0 : i32
    return %arg0, %c0_i32, %c0_i32_0 : i32, i32, i32
  }
  func.func @transform_11(%arg0: i32) -> (i32, i32, i32) {
    %c0_i32 = arith.constant 0 : i32
    %c0_i32_0 = arith.constant 0 : i32
    %c0_i32_1 = arith.constant 0 : i32
    return %arg0, %c0_i32, %c0_i32_0 : i32, i32, i32
  }
  func.func @transform_12(%arg0: i32) -> (i32, i32, i32) {
    %c0_i32 = arith.constant 0 : i32
    %c0_i32_0 = arith.constant 0 : i32
    %c0_i32_1 = arith.constant 0 : i32
    return %arg0, %c0_i32, %c0_i32_0 : i32, i32, i32
  }
  func.func @transform_13(%arg0: i32) -> (i32, i32, i32) {
    %c0_i32 = arith.constant 0 : i32
    %c0_i32_0 = arith.constant 0 : i32
    %c0_i32_1 = arith.constant 0 : i32
    return %arg0, %c0_i32, %c0_i32_0 : i32, i32, i32
  }
  func.func @transform_14(%arg0: i32) -> (i32, i32, i32) {
    %c0_i32 = arith.constant 0 : i32
    %c0_i32_0 = arith.constant 0 : i32
    %c0_i32_1 = arith.constant 0 : i32
    return %arg0, %c0_i32, %c0_i32_0 : i32, i32, i32
  }
  func.func @transform_15(%arg0: i32) -> (i32, i32, i32) {
    %c0_i32 = arith.constant 0 : i32
    %c0_i32_0 = arith.constant 0 : i32
    %c0_i32_1 = arith.constant 0 : i32
    return %arg0, %c0_i32, %c0_i32_0 : i32, i32, i32
  }
  func.func @transform_16(%arg0: i32) -> (i32, i32) {
    %c0_i32 = arith.constant 0 : i32
    %c0_i32_0 = arith.constant 0 : i32
    %c0_i32_1 = arith.constant 0 : i32
    return %c0_i32, %c0_i32_0 : i32, i32
  }
  func.func @transform_17(%arg0: i32) -> (i32, i32) {
    %c0_i32 = arith.constant 0 : i32
    %c0_i32_0 = arith.constant 0 : i32
    %c0_i32_1 = arith.constant 0 : i32
    return %c0_i32, %c0_i32_0 : i32, i32
  }
}

</mosaic_0001>

<bundles_post_ra>
// kernel: tpu_custom_call.1
= control target key start
LH: loop header
LB: loop body
LE: loop exit
PB: predicated region body
PF: predicated region fallthrough
CT: control target
= control target key end

     0   :  { %s3183_s0 = inlined_call_operand.hbm [shape: f32[16,32], index: 0, kind: input, shape index: {}]   ;;  %s3184_s1 = inlined_call_operand.vmem [shape: f32[2,8], index: 1, kind: input, shape index: {}]   ;;  %s3185_s2 = inlined_call_operand.hbm [shape: f32[1,32], index: 2, kind: input, shape index: {}]   ;;  %s3186_s3 = inlined_call_operand.hbm [shape: f32[1,32], index: 3, kind: input, shape index: {}]   ;;  %s3187_s4 = inlined_call_operand.vmem [shape: f32[2,32,96], index: 4, kind: input, shape index: {}]   ;;  %s3188_s5 = inlined_call_operand.vmem [shape: f32[2,1,96], index: 5, kind: input, shape index: {}]   ;;  %s3189_s6 = inlined_call_operand.vmem [shape: f32[2,32,32], index: 6, kind: input, shape index: {}]   ;;  %s3190_s7 = inlined_call_operand.vmem [shape: f32[2,1,32], index: 7, kind: input, shape index: {}]   ;;  %s3191_s8 = inlined_call_operand.vmem [shape: f32[2,1,32], index: 8, kind: input, shape index: {}]   ;;  %s3192_s9 = inlined_call_operand.vmem [shape: f32[2,1,32], index: 9, kind: input, shape index: {}]   ;;  %s3193_s10 = inlined_call_operand.vmem [shape: f32[2,32,64], index: 10, kind: input, shape index: {}]   ;;  %s3194_s11 = inlined_call_operand.vmem [shape: f32[2,1,64], index: 11, kind: input, shape index: {}]   ;;  %s3195_s12 = inlined_call_operand.vmem [shape: f32[2,64,32], index: 12, kind: input, shape index: {}]   ;;  %s3196_s13 = inlined_call_operand.vmem [shape: f32[2,1,32], index: 13, kind: input, shape index: {}]   ;;  %s3197_s14 = inlined_call_operand.vmem [shape: f32[2,1,32], index: 14, kind: input, shape index: {}]   ;;  %s3198_s15 = inlined_call_operand.vmem [shape: f32[2,1,32], index: 15, kind: input, shape index: {}]   ;;  %s3199_s16 = inlined_call_operand.hbm [shape: f32[16,32], index: 16, kind: output, shape index: {0}]   ;;  %s3200_s17 = inlined_call_operand.hbm [shape: f32[16,32], index: 17, kind: output, shape index: {1}]  }
   0x1   :  { %3208 = sst [smem:[#allocation17_spill]] %s3183_s0 }
   0x2   :  { %3209 = sst [smem:[#allocation18_spill]] %s3184_s1 }
   0x3   :  { %3210 = sst [smem:[#allocation19_spill]] %s3185_s2 }
   0x4   :  { %3211 = sst [smem:[#allocation20_spill]] %s3186_s3 }
   0x5   :  { %3212 = sst [smem:[#allocation21_spill]] %s3187_s4 }
   0x6   :  { %3213 = sst [smem:[#allocation22_spill]] %s3189_s6 }
   0x7   :  { %3214 = sst [smem:[#allocation23_spill]] %s3199_s16 }
   0x8   :  { %3215 = sst [smem:[#allocation24_spill]] %s3200_s17 }
   0x9   :  { %23 = vsyncpa [#allocation4], 0 }
   0xa   :  { %24 = vsyncpa [#allocation7], 0 }
   0xb   :  { %25 = vsyncpa [#allocation5], 0 }
   0xc   :  { %26 = vsyncpa [#allocation11], 0  ;;  %s2798_s24 = smov 0  }
   0xd LB: > { %3216 = sst [smem:[#allocation16_spill]] %s2691_s24  ;;  %s2693_s25 = smov [#allocation6]   ;;  %s2691_s24 = sphi %s2798_s24, %s32_s24  }
   0xe   : > { %s504_s26 = sshll.u32 %s2693_s25, 4  ;;  %s2804_s27 = sadd.s32 4294967295, %s2691_s24   ;;  %s505_s26 = int_to_ptr.vmem [resolvable:$true] %s504_s26 }
   0xf   : > { %p2202_p0 = scmp.ge.s32.totalorder %s2691_s24, 1  ;;  %p475_p1 = scmp.lt.s32.totalorder %s2691_s24, 3 }
  0x10   : > { %p3202_p3 = scmp.eq.s32.totalorder %s2804_s27, 0  ;;  %s2694_s29 = smov [#allocation3]  }
  0x11   : > { %p2810_p4 = pnand %p2202_p0, %p475_p1  ;;  %s487_s0 = sshll.u32 %s2694_s29, 4  ;;  %s2822_s0 = int_to_ptr.vmem [resolvable:$true] %s487_s0 }
  0x12   : > { %s2695_s18 = smov [#allocation8]   ;;  %s3219_s2 = sld [smem:[#allocation19_spill]] }
  0x13   : > { %s3217_s28 = scalar_select %p2810_p4, 1, 0 }
  0x14   : > { %p2458_p5 = pneg %p2810_p4  ;;  %s515_s19 = sshll.u32 %s2695_s18, 4  ;;  %s2824_s19 = int_to_ptr.vmem [resolvable:$true] %s515_s19 }
  0x16   : > { %p2818_p6 = pnand %p3202_p3, %p2458_p5 }
  0x18   : > { %s2533_s21 = scalar_lea.hbm %s3219_s2, 16  ;;  %p2834_p8 = pneg %p2818_p6 }
  0x19   : > { %p2534_p7 = scmp.ne.s32.totalorder %s3219_s2, %s2533_s21  ;;  %p2540_p11 = scmp.lt.u32.totalorder %s2533_s21, %s3219_s2 }
  0x1b   : > { %p2536_p9 = pnand %p2834_p8, %p2534_p7 }
  0x1d   : > { %p2537_p10 = pneg %p2536_p9 }
  0x1f   : > { %p2542_p12 = pnand %p2540_p11, %p2537_p10 }
  0x21   : > { %2545 = shalt.err (!%p2542_p12)
}
  0x22   : > { %s2546_s1 = scalar_lea.vmem %s505_s26, 16  ;;  %s2553_s20 = scalar_lea.vmem %s505_s26, 32 }
  0x23   : > { %p2547_p13 = scmp.ne.s32.totalorder %s505_s26, %s2546_s1  ;;  %p2554_p5 = scmp.lt.s32.totalorder %s505_s26, %s505_s26 }
  0x24   : > { %p2555_p2 = scmp.lt.s32.totalorder %s2553_s20, %s2546_s1 }
  0x25   : > { %p2549_p0 = pnand %p2547_p13, %p2834_p8 }
  0x26   : > { %p2556_p3 = por %p2555_p2, %p2554_p5 }
  0x27   : > { %p2550_p1 = pneg %p2549_p0 }
  0x29   : > { %p2557_p4 = pnand %p2556_p3, %p2550_p1 }
  0x2b   : > { %2560 = shalt.err (!%p2557_p4)
}
  0x2c   : > { %2464 = dma.hbm_to_vmem [thread:$0]  (!%p2818_p6), %s3219_s2, 16, %s505_s26, [#allocation7]  }
  0x2d   : > { %s3221_s18 = sld [smem:[#allocation17_spill]] }
  0x33   : > { %s2561_s24 = scalar_lea.hbm %s3221_s18, 256 }
  0x34   : > { %p2562_p7 = scmp.ne.s32.totalorder %s3221_s18, %s2561_s24  ;;  %p2568_p3 = scmp.lt.u32.totalorder %s2561_s24, %s3221_s18 }
  0x36   : > { %p2564_p9 = pnand %p2562_p7, %p2834_p8 }
  0x38   : > { %p2565_p2 = pneg %p2564_p9 }
  0x3a   : > { %p2570_p4 = pnand %p2568_p3, %p2565_p2 }
  0x3c   : > { %2573 = shalt.err (!%p2570_p4)
}
  0x3d   : > { %s2574_s26 = scalar_lea.vmem %s2822_s0, 256  ;;  %p2582_p13 = scmp.lt.s32.totalorder %s2822_s0, %s2822_s0 }
  0x3e   : > { %p2575_p10 = scmp.ne.s32.totalorder %s2822_s0, %s2574_s26  ;;  %p2583_p0 = scmp.lt.s32.totalorder %s2574_s26, %s2574_s26 }
  0x40   : > { %p2577_p11 = pnand %p2575_p10, %p2834_p8  ;;  %p2584_p1 = por %p2583_p0, %p2582_p13 }
  0x42   : > { %p2578_p12 = pneg %p2577_p11 }
  0x44   : > { %p2585_p5 = pnand %p2584_p1, %p2578_p12 }
  0x46   : > { %2588 = shalt.err (!%p2585_p5)
}
  0x47   : > { %s2696_s16 = smov 128   ;;  %s2697_s17 = smov 8  }
  0x48   : > { %2461 = dma.hbm_to_vmem [thread:$0]  (!%p2818_p6), %s3221_s18, 256, %s2822_s0, [#allocation4], %s2696_s16, %s2696_s16, %s2697_s17  }
  0x49   : > { %s3222_s3 = sld [smem:[#allocation20_spill]] }
  0x4f   : > { %s2589_s29 = scalar_lea.hbm %s3222_s3, 16 }
  0x50   : > { %p2590_p7 = scmp.ne.s32.totalorder %s3222_s3, %s2589_s29  ;;  %p2596_p3 = scmp.lt.u32.totalorder %s2589_s29, %s3222_s3 }
  0x52   : > { %p2592_p9 = pnand %p2590_p7, %p2834_p8 }
  0x54   : > { %p2593_p2 = pneg %p2592_p9 }
  0x56   : > { %p2598_p4 = pnand %p2596_p3, %p2593_p2 }
  0x58   : > { %2601 = shalt.err (!%p2598_p4)
}
  0x59   : > { %s2602_s0 = scalar_lea.vmem %s2824_s19, 16  ;;  %s2609_s16 = scalar_lea.vmem %s2824_s19, 32 }
  0x5a   : > { %p2603_p10 = scmp.ne.s32.totalorder %s2824_s19, %s2602_s0  ;;  %p2610_p13 = scmp.lt.s32.totalorder %s2824_s19, %s2824_s19 }
  0x5b   : > { %p2611_p0 = scmp.lt.s32.totalorder %s2609_s16, %s2602_s0 }
  0x5c   : > { %p2605_p11 = pnand %p2603_p10, %p2834_p8 }
  0x5d   : > { %p2612_p1 = por %p2611_p0, %p2610_p13 }
  0x5e   : > { %p2606_p12 = pneg %p2605_p11 }
  0x60   : > { %p2613_p5 = pnand %p2612_p1, %p2606_p12 }
  0x62   : > { %2616 = shalt.err (!%p2613_p5)
}
  0x63   : > { %2467 = dma.hbm_to_vmem [thread:$0]  (!%p2818_p6), %s3222_s3, 16, %s2824_s19, [#allocation7]  }
  0x64   : > { %p3223_p7 = scmp.ne.s32.totalorder %s3217_s28, 0 }
  0x65   : > { %p3224_p8 = scmp.eq.s32.totalorder (!%p3223_p7), %s2804_s27, 0 }
  0x66   : > { %608 = sbr.rel (%p3223_p7) target bundleno = 3136 (0xc40), region = 84 }
  0x6d   : > { %2674 = dma.done.wait (%p3224_p8), [#allocation4], 256   ;;  %p3225_p9 = pmov %p3224_p8 }
  0x6e   : > { %p3226_p2 = pmov %p3224_p8 }
  0x6f   : > { %2676 = vsyncadd (%p3225_p9), [#allocation4], 4294967040 }
  0x70   : > { %2678 = dma.done.wait (%p3226_p2), [#allocation7], 32   ;;  %p3227_p3 = pmov %p3226_p2 }
  0x71   : > { %p702_p4 = scmp.lt.s32.totalorder %s2804_s27, 1  ;;  %s3228_s4 = sld [smem:[#allocation21_spill]] }
  0x72   : > { %2680 = vsyncadd (%p3227_p3), [#allocation7], 4294967264  ;;  %s3229_s6 = sld [smem:[#allocation22_spill]]  ;;  %p3230_p6 = scmp.ne.s32.totalorder %s2804_s27, 0 }
  0x73   : > { %s2909_s30 = scalar_select %p702_p4, %s2804_s27, 1 }
  0x74   : > { %749 = sbr.rel (%p3230_p6) target bundleno = 435 (0x1b3), region = 100  ;;  %v750_v0 = vld [vmem:[#allocation3] sm:$0xff] (!%p3230_p6)  ;;  %vm754_vm0 = vcmask (!%p3230_p6), 261120   ;;  %v751_v1 = vld [vmem:[#allocation3 + $0x8] sm:$0xff] (!%p3230_p6)  ;;  %v2220_v21 = vld [vmem:[#allocation6] ss:$0 sm:$0xff] (!%p3230_p6) }
  0x75   : > { %s2258_s28 = sshll.u32 %s2909_s30, 5  ;;  %s2261_s18 = sshll.u32 %s2909_s30, 6  ;;  %v755_v2 = vsel (!%p3230_p6), %vm754_vm0, %v750_v0, 0.0  ;;  %v758_v3 = vsel (!%p3230_p6), %vm754_vm0, %v751_v1, 0.0  ;;  %v2221_v23 = vld [vmem:[#allocation8] ss:$0 sm:$0xff] (!%p3230_p6) }
  0x76   : > { %s2951_s16 = scalar_lea.vmem %s3195_s12, %s2261_s18  ;;  %s739_s19 = scalar_lea.vmem %s3196_s13, %s2909_s30  ;;  %756 = vadd.xlane.f32.xlu0 (!%p3230_p6), %v755_v2 }
  0x77   : > { %s2919_s21 = scalar_lea.vmem %s3228_s4, %s2258_s28  ;;  %s2941_s4 = scalar_lea.vmem %s3193_s10, %s2258_s28 }
  0x78   : > { %s2924_s20 = scalar_lea.vmem %s3229_s6, %s2258_s28  ;;  %s731_s6 = scalar_lea.vmem %s3194_s11, %s2909_s30 }
  0x79   : > { %s742_s22 = scalar_lea.vmem %s3197_s14, %s2909_s30  ;;  %s745_s3 = scalar_lea.vmem %s3198_s15, %s2909_s30 }
  0x7a   : > { %759 = vadd.xlane.f32.xlu0 (!%p3230_p6), %v758_v3 }
 0x103   : > { %v757_v4 = vpop.xlane.xlu0 %756 }
 0x104   : > { %v762_v5 = vmul.f32 0.03125, %v757_v4 }
 0x106   : > { %v764_v6 = vsub.f32 %v750_v0, %v762_v5 }
 0x107   : > { %v760_v7 = vpop.xlane.xlu0 %759 }
 0x108   : > { %v763_v8 = vmul.f32 0.03125, %v760_v7  ;;  %v766_v9 = vmul.f32 %v764_v6, %v764_v6 }
 0x10a   : > { %v765_v10 = vsub.f32 %v751_v1, %v763_v8  ;;  %v768_v11 = vsel %vm754_vm0, %v766_v9, 0.0 }
 0x10b   : > { %769 = vadd.xlane.f32.xlu1 %v768_v11 }
 0x10c   : > { %v767_v12 = vmul.f32 %v765_v10, %v765_v10 }
 0x10e   : > { %v771_v13 = vsel %vm754_vm0, %v767_v12, 0.0 }
 0x10f   : > { %772 = vadd.xlane.f32.xlu1 %v771_v13 }
 0x198   : > { %v770_v14 = vpop.xlane.xlu1 %769 }
 0x199   : > { %v774_v15 = vmul.f32 0.03125, %v770_v14 }
 0x19b   : > { %v776_v16 = vadd.f32 1e-12, %v774_v15 }
 0x19c   : > { %v773_v17 = vpop.xlane.xlu1 %772 }
 0x19d   : > { %2501 = vrsqrt.f32 %v776_v16  ;;  %v775_v18 = vmul.f32 0.03125, %v773_v17 }
 0x19f   : > { %v777_v19 = vadd.f32 1e-12, %v775_v18 }
 0x1a1   : > { %2503 = vrsqrt.f32 %v777_v19 }
 0x1a7   : > { %v2502_v20 = vpop.eup %2501 }
 0x1a8   : > { %v780_v22 = vmul.f32 %v2502_v20, %v764_v6 }
 0x1aa   : > { %v788_v24 = vmul.f32 %v2220_v21, %v780_v22 }
 0x1ab   : > { %v2504_v25 = vpop.eup %2503 }
 0x1ac   : > { %v796_v26 = vadd.f32 %v2221_v23, %v788_v24  ;;  %v781_v27 = vmul.f32 %v2504_v25, %v765_v10 }
 0x1ae   : > { %798 = vst.msk [vmem:[#allocation2] sm:$0xff] %vm754_vm0, %v796_v26  ;;  %v789_v28 = vmul.f32 %v2220_v21, %v781_v27 }
 0x1b0   : > { %v797_v29 = vadd.f32 %v2221_v23, %v789_v28 }
 0x1b2   : > { %799 = vst.msk [vmem:[#allocation2 + $0x8] sm:$0xff] %vm754_vm0, %v797_v29 }
 0x1b3 PF: > { %v802_v30 = vld [vmem:[%s2919_s21] sm:$0xff]  ;;  %v803_v31 = vld [vmem:[%s2919_s21 + $0x8] sm:$0xff]  ;;  %v804_v32 = vld [vmem:[%s2919_s21 + $0x10] sm:$0xff]  ;;  %vm836_vm1 = vcmask 261120   ;;  %v2698_v38 = vmov 0.0   ;;  %vm2699_vm2 = vmmov 0   ;;  %v1237_v52 = vlaneseq  ;;  %s3233_s23 = scalar_lea.vmem %s3190_s7, %s2909_s30 }
 0x1b4   : > { %v2398_v33 = vpack.c.bf16 %v803_v31, %v802_v30  ;;  %v805_v34 = vld [vmem:[%s2919_s21 + $0x18] sm:$0xff]  ;;  %2327 = vmatprep.subr.mxu0 %v2698_v38  ;;  %2329 = vmatprep.mubr.msk.f32.mxu0 %vm2699_vm2, %v2698_v38  ;;  %s3231_s21 = scalar_lea.vmem %s3188_s5, %s2909_s30  ;;  %s2700_s29 = smov 96   ;;  %vm930_vm3 = vcmask 130048   ;;  %vm1249_vm4 = vcmask 64512   ;;  %vm1851_vm5 = vcmask 523264  }
 0x1b5   : > { %v2977_v35 = vld [vmem:[#allocation2] sm:$0xff]  ;;  %v2402_v36 = vpack.c.bf16 %v805_v34, %v804_v32  ;;  %s2701_s1 = smov 112   ;;  %v1238_v53 = vshrl.u32 %v1237_v52, 7  ;;  %s3232_s2 = sld [smem:[#allocation18_spill]] }
 0x1b6   : > { %2314 = vmatprep.mubr.msk.f32.mxu1 %vm836_vm1, %v2977_v35  ;;  %2399 = vmatprep.subr.bf16.mxu1 %v2398_v33  ;;  %v2222_v39 = vld [vmem:[%s3231_s21] ss:$0 sm:$0xff]  ;;  %s2702_s17 = smov 64   ;;  %s2703_s25 = smov 16  }
 0x1b7   : > { %2401 = vmatpush3.bf16.msra.mxu1 %v2398_v33  ;;  %v1239_v54 = vsub.s32 0, %v1238_v53  ;;  %v807_v52 = vld [vmem:[%s2924_s20] sm:$0xff]  ;;  %v808_v53 = vld [vmem:[%s2924_s20 + $0x8] sm:$0xff]  ;;  %s3234_s21 = scalar_lea.vmem %s3191_s8, %s2909_s30  ;;  %p3236_p10 = scmp.ne.s32.totalorder %s2804_s27, 0 }
 0x1b8   : > { %2403 = vmatprep.subr.bf16.mxu1 %v2402_v36 }
 0x1b9   : > { %v2981_v37 = vld [vmem:[#allocation2 + $0x8] sm:$0xff] }
 0x1bb   : > { %2405 = vmatpush3.bf16.msra.mxu1 %v2402_v36  ;;  %v918_v55 = vld [vmem:[%s3232_s2] sm:$0x3] }
 0x1bc   : > { %2317 = vmatprep.subr.mxu1 %v2698_v38  ;;  %v926_v56 = vrot.slane %v918_v55, 1  ;;  %v1240_v61 = vrot.slane %v918_v55, %v1239_v54  ;;  %v809_v55 = vld [vmem:[%s2924_s20 + $0x10] sm:$0xff] }
 0x1be   : > { %2315 = vmatmul.mubr.msk.f32.vlgmr.msra.gmra.mrb[0].mxu1 %vm836_vm1, %v2981_v37  ;;  %v1244_v63 = vrot.slane %v926_v56, %v1239_v54  ;;  %v2406_v54 = vpack.c.bf16 %v808_v53, %v807_v52  ;;  %v810_v56 = vld [vmem:[%s2924_s20 + $0x18] sm:$0xff]  ;;  %v823_v53 = vld [vmem:[%s2951_s16 + $0x20] sm:$0xff] }
 0x1bf   : > { %2319 = vmatprep.mubr.msk.f32.mxu1 %vm2699_vm2, %v2698_v38 }
 0x291   : > { %v2316_v40 = vpop.f32.mrb[0].mxu1 }
 0x292   : > { %v909_v41 = vpop.f32.mrb[1].mxu1  ;;  %v3000_v43 = vadd.f32 %v2316_v40, %v2222_v39 }
 0x293   : > { %v2996_v42 = vadd.f32 %v2222_v39, %v909_v41 }
 0x295   : > { %928 = vrot.lane.b32.xlu1 %v2996_v42, %s2700_s29  ;;  %920 = vrot.lane.b32.xlu0 %v2996_v42, %s2701_s1 }
 0x299   : > { %923 = vrot.lane.b32.xlu0 %v3000_v43, %s2701_s1  ;;  %s3235_s1 = scalar_lea.vmem %s3192_s9, %s2909_s30 }
 0x307   : > { %v929_v44 = vpop.permute.xlu1 %928  ;;  %v3003_v45 = vpop.permute.xlu0 %920 }
 0x308   : > { %2318 = vmatpush3.xpose.msk.msra.mxu1 %vm930_vm3, %v929_v44  ;;  %1005 = vrot.lane.b32.xlu1 %v3003_v45, %s2700_s29 }
 0x309   : > { %2322 = vmatprep.subr.mxu1 %v2698_v38 }
 0x30b   : > { %2320 = vmatmul.mubr.msk.f32.vlgmr.msra.gmra.mrb[2].mxu1 %vm930_vm3, %v2996_v42  ;;  %v3010_v46 = vpop.permute.xlu0 %923 }
 0x30c   : > { %1081 = vrot.lane.b32.xlu1 %v3000_v43, %s2700_s29  ;;  %1157 = vrot.lane.b32.xlu0 %v3010_v46, %s2700_s29 }
 0x30d   : > { %2324 = vmatprep.mubr.msk.f32.mxu1 %vm2699_vm2, %v2698_v38 }
 0x37a   : > { %v1006_v47 = vpop.permute.xlu1 %1005 }
 0x37b   : > { %2323 = vmatpush3.xpose.msk.msra.mxu1 %vm930_vm3, %v1006_v47 }
 0x37c   : > { %2332 = vmatprep.subr.mxu1 %v2698_v38 }
 0x37e   : > { %2325 = vmatmul.mubr.msk.f32.vlgmr.msra.gmra.mrb[4].mxu1 %vm930_vm3, %v3003_v45  ;;  %v1082_v48 = vpop.permute.xlu1 %1081  ;;  %v1158_v49 = vpop.permute.xlu0 %1157 }
 0x37f   : > { %2328 = vmatpush3.xpose.msk.msra.mxu0 %vm930_vm3, %v1082_v48  ;;  %2333 = vmatpush3.xpose.msk.msra.mxu1 %vm930_vm3, %v1158_v49 }
 0x380   : > { %2334 = vmatprep.mubr.msk.f32.mxu1 %vm2699_vm2, %v2698_v38  ;;  %2342 = vmatprep.subr.mxu1 %v2698_v38 }
 0x381   : > { %2337 = vmatprep.subr.mxu0 %v2698_v38 }
 0x382   : > { %2330 = vmatmul.mubr.msk.f32.vlgmr.msra.gmra.mrb[0].mxu0 %vm930_vm3, %v3000_v43  ;;  %2335 = vmatmul.mubr.msk.f32.vlgmr.msra.gmra.mrb[6].mxu1 %vm930_vm3, %v3010_v46 }
 0x383   : > { %2344 = vmatprep.mubr.msk.f32.mxu1 %vm2699_vm2, %v2698_v38  ;;  %2339 = vmatprep.mubr.msk.f32.mxu0 %vm2699_vm2, %v2698_v38 }
 0x3de   : > { %v1001_v50 = vpop.f32.mrb[2].mxu1 }
 0x3df   : > { %v2321_v51 = vpop.f32.mrb[3].mxu1  ;;  %v1233_v58 = vmul.f32 0.25, %v1001_v50 }
 0x3e1   : > { %v1245_v7 = vadd.f32 %v1240_v61, %v1233_v58 }
 0x3e3   : > { %v1250_v9 = vsel %vm1249_vm4, %v1245_v7, -inf }
 0x451   : > { %v1077_v57 = vpop.f32.mrb[4].mxu1 }
 0x452   : > { %v1234_v59 = vmul.f32 0.25, %v1077_v57  ;;  %v2326_v60 = vpop.f32.mrb[5].mxu1  ;;  %v2410_v57 = vpack.c.bf16 %v810_v56, %v809_v55  ;;  %v825_v56 = vld [vmem:[%s2951_s16 + $0x30] sm:$0xff] }
 0x454   : > { %v1246_v62 = vadd.f32 %v1240_v61, %v1234_v59 }
 0x455   : > { %v1153_v0 = vpop.f32.mrb[0].mxu0  ;;  %v1229_v1 = vpop.f32.mrb[6].mxu1 }
 0x456   : > { %v1235_v2 = vmul.f32 0.25, %v1153_v0  ;;  %v1236_v3 = vmul.f32 0.25, %v1229_v1  ;;  %v2331_v4 = vpop.f32.mrb[1].mxu0  ;;  %v2336_v5 = vpop.f32.mrb[7].mxu1  ;;  %v1253_v6 = vsel %vm1249_vm4, %v1246_v62, -inf }
 0x457   : > { %1254 = vmax.xlane.f32.xlu0 %v1253_v6  ;;  %v2237_v5 = vld [vmem:[%s3233_s23] ss:$0 sm:$0xff] }
 0x458   : > { %v1248_v8 = vadd.f32 %v1244_v63, %v1236_v3  ;;  %v1247_v11 = vadd.f32 %v1244_v63, %v1235_v2 }
 0x45a   : > { %v1259_v10 = vsel %vm1249_vm4, %v1248_v8, -inf  ;;  %v1256_v12 = vsel %vm1249_vm4, %v1247_v11, -inf }
 0x45b   : > { %1251 = vmax.xlane.f32.xlu0 %v1250_v9  ;;  %1260 = vmax.xlane.f32.xlu1 %v1259_v10 }
 0x45f   : > { %1257 = vmax.xlane.f32.xlu0 %v1256_v12 }
 0x4e4   : > { %v1255_v13 = vpop.xlane.xlu0 %1254 }
 0x4e5   : > { %v1263_v14 = vsub.f32 %v1246_v62, %v1255_v13 }
 0x4e7   : > { %v1268_v15 = vmul.f32 1.442695, %v1263_v14 }
 0x4e8   : > { %v1261_v16 = vpop.xlane.xlu1 %1260  ;;  %v1252_v23 = vpop.xlane.xlu0 %1251 }
 0x4e9   : > { %2505 = vpow2.f32 %v1268_v15  ;;  %v1265_v17 = vsub.f32 %v1248_v8, %v1261_v16  ;;  %v1262_v24 = vsub.f32 %v1245_v7, %v1252_v23  ;;  %v815_v23 = vld [vmem:[%s2941_s4 + $0x8] sm:$0xff] }
 0x4eb   : > { %v1272_v18 = vmul.f32 1.442695, %v1265_v17  ;;  %v1266_v26 = vmul.f32 1.442695, %v1262_v24 }
 0x4ec   : > { %v1258_v25 = vpop.xlane.xlu0 %1257 }
 0x4ed   : > { %2507 = vpow2.f32 %v1272_v18  ;;  %v1264_v27 = vsub.f32 %v1247_v11, %v1258_v25  ;;  %v816_v25 = vld [vmem:[%s2941_s4 + $0x10] sm:$0xff] }
 0x4ee   : > { %2509 = vpow2.f32 %v1266_v26  ;;  %v817_v26 = vld [vmem:[%s2941_s4 + $0x18] sm:$0xff] }
 0x4ef   : > { %v1270_v28 = vmul.f32 1.442695, %v1264_v27  ;;  %v2418_v27 = vpack.c.bf16 %v817_v26, %v816_v25 }
 0x4f1   : > { %2511 = vpow2.f32 %v1270_v28 }
 0x4f3   : > { %v2506_v19 = vpop.eup %2505 }
 0x4f4   : > { %v1277_v20 = vsel %vm1249_vm4, %v2506_v19, 0.0 }
 0x4f5   : > { %1278 = vadd.xlane.f32.xlu1 %v1277_v20 }
 0x4f7   : > { %v2508_v21 = vpop.eup %2507 }
 0x4f8   : > { %v1283_v22 = vsel %vm1249_vm4, %v2508_v21, 0.0  ;;  %v2510_v29 = vpop.eup %2509 }
 0x4f9   : > { %1284 = vadd.xlane.f32.xlu0 %v1283_v22  ;;  %v1274_v30 = vsel %vm1249_vm4, %v2510_v29, 0.0  ;;  %v814_v22 = vld [vmem:[%s2941_s4] sm:$0xff] }
 0x4fa   : > { %v2414_v24 = vpack.c.bf16 %v815_v23, %v814_v22 }
 0x4fb   : > { %v2512_v31 = vpop.eup %2511 }
 0x4fc   : > { %v1280_v32 = vsel %vm1249_vm4, %v2512_v31, 0.0 }
 0x506   : > { %1370 = vrot.lane.b32.xlu1 %v3003_v45, %s2702_s17 }
 0x50f   : > { %1522 = vrot.lane.b32.xlu0 %v3010_v46, %s2702_s17 }
 0x52a   : > { %1275 = vadd.xlane.f32.xlu1 %v1274_v30 }
 0x52e   : > { %1281 = vadd.xlane.f32.xlu0 %v1280_v32 }
 0x53b   : > { %1294 = vrot.lane.b32.xlu1 %v2996_v42, %s2702_s17 }
 0x544   : > { %1446 = vrot.lane.b32.xlu0 %v3000_v43, %s2702_s17 }
 0x582   : > { %v1279_v33 = vpop.xlane.xlu1 %1278 }
 0x583   : > { %2513 = vrcp.f32 %v1279_v33 }
 0x586   : > { %v1371_v34 = vpop.permute.xlu1 %1370  ;;  %v1285_v36 = vpop.xlane.xlu0 %1284 }
 0x587   : > { %2515 = vrcp.f32 %v1285_v36  ;;  %2343 = vmatpush3.msra.mxu1 %v1371_v34  ;;  %v2240_v36 = vld [vmem:[%s3234_s21] ss:$0 sm:$0xff] }
 0x588   : > { %2352 = vmatprep.subr.mxu1 %v2698_v38 }
 0x58a   : > { %v1523_v41 = vpop.permute.xlu0 %1522 }
 0x58d   : > { %v2514_v39 = vpop.eup %2513 }
 0x58e   : > { %v1291_v40 = vmul.f32 %v2514_v39, %v2506_v19 }
 0x590   : > { %2345 = vmatmul.mubr.msk.f32.vlgmr.msra.gmra.mrb[8].mxu1 %vm1249_vm4, %v1291_v40  ;;  %v2241_v40 = vld [vmem:[%s3235_s1] ss:$0 sm:$0xff] }
 0x591   : > { %v2516_v44 = vpop.eup %2515  ;;  %2353 = vmatpush3.msra.mxu1 %v1523_v41  ;;  %2354 = vmatprep.mubr.msk.f32.mxu1 %vm2699_vm2, %v2698_v38 }
 0x592   : > { %v1293_v42 = vmul.f32 %v2516_v44, %v2508_v21  ;;  %2415 = vmatprep.subr.bf16.mxu1 %v2414_v24 }
 0x594   : > { %2355 = vmatmul.mubr.msk.f32.vlgmr.msra.gmra.mrb[10].mxu1 %vm1249_vm4, %v1293_v42 }
 0x595   : > { %2417 = vmatpush3.bf16.msra.mxu1 %v2414_v24 }
 0x596   : > { %2419 = vmatprep.subr.bf16.mxu1 %v2418_v27 }
 0x599   : > { %2421 = vmatpush3.bf16.msra.mxu1 %v2418_v27 }
 0x5b7   : > { %v1276_v43 = vpop.xlane.xlu1 %1275 }
 0x5b8   : > { %2517 = vrcp.f32 %v1276_v43 }
 0x5bb   : > { %v1295_v45 = vpop.permute.xlu1 %1294  ;;  %v1282_v46 = vpop.xlane.xlu0 %1281 }
 0x5bc   : > { %2519 = vrcp.f32 %v1282_v46  ;;  %2338 = vmatpush3.msra.mxu0 %v1295_v45 }
 0x5bd   : > { %2347 = vmatprep.subr.mxu0 %v2698_v38 }
 0x5bf   : > { %v1447_v49 = vpop.permute.xlu0 %1446 }
 0x5c2   : > { %v2518_v47 = vpop.eup %2517 }
 0x5c3   : > { %v1290_v48 = vmul.f32 %v2518_v47, %v2510_v29  ;;  %v819_v47 = vld [vmem:[%s2951_s16] sm:$0xff] }
 0x5c5   : > { %2340 = vmatmul.mubr.msk.f32.vlgmr.msra.gmra.mrb[2].mxu0 %vm1249_vm4, %v1290_v48  ;;  %v820_v48 = vld [vmem:[%s2951_s16 + $0x8] sm:$0xff] }
 0x5c6   : > { %v2520_v50 = vpop.eup %2519  ;;  %2348 = vmatpush3.msra.mxu0 %v1447_v49  ;;  %2349 = vmatprep.mubr.msk.f32.mxu0 %vm2699_vm2, %v2698_v38  ;;  %v2422_v49 = vpack.c.bf16 %v820_v48, %v819_v47  ;;  %v2249_v47 = vld [vmem:[%s745_s3] ss:$0 sm:$0xff] }
 0x5c7   : > { %v1292_v51 = vmul.f32 %v2520_v50, %v2512_v31  ;;  %2407 = vmatprep.subr.bf16.mxu0 %v2406_v54  ;;  %v821_v50 = vld [vmem:[%s2951_s16 + $0x10] sm:$0xff] }
 0x5c9   : > { %2350 = vmatmul.mubr.msk.f32.vlgmr.msra.gmra.mrb[4].mxu0 %vm1249_vm4, %v1292_v51  ;;  %v822_v51 = vld [vmem:[%s2951_s16 + $0x18] sm:$0xff] }
 0x5ca   : > { %2409 = vmatpush3.bf16.msra.mxu0 %v2406_v54  ;;  %v2426_v52 = vpack.c.bf16 %v822_v51, %v821_v50  ;;  %v824_v54 = vld [vmem:[%s2951_s16 + $0x28] sm:$0xff] }
 0x5cb   : > { %2411 = vmatprep.subr.bf16.mxu0 %v2410_v57  ;;  %v2430_v55 = vpack.c.bf16 %v824_v54, %v823_v53 }
 0x5ce   : > { %2413 = vmatpush3.bf16.msra.mxu0 %v2410_v57  ;;  %v826_v57 = vld [vmem:[%s2951_s16 + $0x38] sm:$0xff] }
 0x5cf   : > { %2423 = vmatprep.subr.bf16.mxu0 %v2422_v49 }
 0x663   : > { %v1442_v58 = vpop.f32.mrb[8].mxu1 }
 0x664   : > { %v2346_v59 = vpop.f32.mrb[9].mxu1  ;;  %1599 = vrot.lane.b32.xlu1 %v1442_v58, %s2703_s25  ;;  %v2434_v58 = vpack.c.bf16 %v826_v57, %v825_v56 }
 0x665   : > { %v2242_v59 = vld [vmem:[%s731_s6] ss:$0 sm:$0xff] }
 0x667   : > { %v1594_v60 = vpop.f32.mrb[10].mxu1 }
 0x668   : > { %1604 = vrot.lane.b32.xlu1 %v1594_v60, %s2703_s25  ;;  %v2356_v38 = vpop.f32.mrb[11].mxu1 }
 0x698   : > { %v1366_v61 = vpop.f32.mrb[2].mxu0 }
 0x699   : > { %v2341_v62 = vpop.f32.mrb[3].mxu0 }
 0x69c   : > { %v1518_v63 = vpop.f32.mrb[4].mxu0 }
 0x69d   : > { %v2351_v0 = vpop.f32.mrb[5].mxu0 }
 0x6d6   : > { %v1600_v1 = vpop.permute.xlu1 %1599 }
 0x6d7   : > { %v1602_v2 = vsel %vm930_vm3, %v1366_v61, %v1600_v1 }
 0x6d8   : > { %2365 = vmatprep.mubr.msk.f32.mxu0 %vm836_vm1, %v1602_v2 }
 0x6da   : > { %v1605_v3 = vpop.permute.xlu1 %1604 }
 0x6db   : > { %v1607_v4 = vsel %vm930_vm3, %v1518_v63, %v1605_v3 }
 0x6dc   : > { %2366 = vmatmul.mubr.msk.f32.vlgmr.msra.gmra.mrb[6].mxu0 %vm836_vm1, %v1607_v4 }
 0x6dd   : > { %2425 = vmatpush3.bf16.msra.mxu0 %v2422_v49 }
 0x6de   : > { %2427 = vmatprep.subr.bf16.mxu0 %v2426_v52 }
 0x6e1   : > { %2429 = vmatpush3.bf16.msra.mxu0 %v2426_v52 }
 0x6e2   : > { %2431 = vmatprep.subr.bf16.mxu0 %v2430_v55 }
 0x6e5   : > { %2433 = vmatpush3.bf16.msra.mxu0 %v2430_v55 }
 0x6e6   : > { %2435 = vmatprep.subr.bf16.mxu0 %v2434_v58 }
 0x6e9   : > { %2437 = vmatpush3.bf16.msra.mxu0 %v2434_v58 }
 0x7af   : > { %v2367_v6 = vpop.f32.mrb[6].mxu0 }
 0x7b0   : > { %v1692_v7 = vadd.f32 %v2367_v6, %v2237_v5  ;;  %v1686_v8 = vpop.f32.mrb[7].mxu0 }
 0x7b1   : > { %v1687_v9 = vadd.f32 %v2237_v5, %v1686_v8 }
 0x7b2   : > { %v1696_v10 = vadd.f32 %v1692_v7, %v2981_v37 }
 0x7b3   : > { %v1695_v11 = vadd.f32 %v1687_v9, %v2977_v35 }
 0x7b4   : > { %v1700_v12 = vsel %vm836_vm1, %v1696_v10, 0.0 }
 0x7b5   : > { %1701 = vadd.xlane.f32.xlu1 %v1700_v12  ;;  %v1697_v13 = vsel %vm836_vm1, %v1695_v11, 0.0 }
 0x7b6   : > { %1698 = vadd.xlane.f32.xlu0 %v1697_v13 }
 0x842   : > { %v1702_v14 = vpop.xlane.xlu1 %1701 }
 0x843   : > { %v1705_v15 = vmul.f32 0.03125, %v1702_v14  ;;  %v1699_v16 = vpop.xlane.xlu0 %1698 }
 0x844   : > { %v1704_v17 = vmul.f32 0.03125, %v1699_v16 }
 0x845   : > { %v1707_v18 = vsub.f32 %v1696_v10, %v1705_v15 }
 0x846   : > { %v1706_v19 = vsub.f32 %v1695_v11, %v1704_v17  ;;  %v2245_v17 = vld [vmem:[%s739_s19] ss:$0 sm:$0xff] }
 0x847   : > { %v1709_v35 = vmul.f32 %v1707_v18, %v1707_v18 }
 0x848   : > { %v1708_v20 = vmul.f32 %v1706_v19, %v1706_v19 }
 0x849   : > { %v1713_v21 = vsel %vm836_vm1, %v1709_v35, 0.0 }
 0x84a   : > { %v1710_v37 = vsel %vm836_vm1, %v1708_v20, 0.0 }
 0x84b   : > { %1711 = vadd.xlane.f32.xlu0 %v1710_v37 }
 0x84f   : > { %1714 = vadd.xlane.f32.xlu0 %v1713_v21 }
 0x8d8   : > { %v1712_v28 = vpop.xlane.xlu0 %1711 }
 0x8d9   : > { %v1716_v29 = vmul.f32 0.03125, %v1712_v28 }
 0x8db   : > { %v1718_v30 = vadd.f32 1e-12, %v1716_v29 }
 0x8dc   : > { %v1715_v31 = vpop.xlane.xlu0 %1714 }
 0x8dd   : > { %2521 = vrsqrt.f32 %v1718_v30  ;;  %v1717_v32 = vmul.f32 0.03125, %v1715_v31 }
 0x8df   : > { %v1719_v33 = vadd.f32 1e-12, %v1717_v32 }
 0x8e1   : > { %2523 = vrsqrt.f32 %v1719_v33 }
 0x8e7   : > { %v2522_v34 = vpop.eup %2521 }
 0x8e8   : > { %v1722_v39 = vmul.f32 %v2522_v34, %v1706_v19 }
 0x8ea   : > { %v1730_v41 = vmul.f32 %v2240_v36, %v1722_v39 }
 0x8eb   : > { %v2524_v44 = vpop.eup %2523 }
 0x8ec   : > { %v1723_v42 = vmul.f32 %v2524_v44, %v1707_v18  ;;  %v1738_v43 = vadd.f32 %v2241_v40, %v1730_v41 }
 0x8ee   : > { %v1731_v45 = vmul.f32 %v2240_v36, %v1723_v42  ;;  %2376 = vmatprep.mubr.msk.f32.mxu1 %vm836_vm1, %v1738_v43 }
 0x8f0   : > { %v1739_v46 = vadd.f32 %v2241_v40, %v1731_v45 }
 0x8f2   : > { %2377 = vmatmul.mubr.msk.f32.vlgmr.msra.gmra.mrb[12].mxu1 %vm836_vm1, %v1739_v46 }
 0x9c5   : > { %v2378_v60 = vpop.f32.mrb[12].mxu1 }
 0x9c6   : > { %v1824_v38 = vadd.f32 %v2378_v60, %v2242_v59  ;;  %v1818_v61 = vpop.f32.mrb[13].mxu1 }
 0x9c7   : > { %v1819_v62 = vadd.f32 %v2242_v59, %v1818_v61 }
 0x9c8   : > { %v1828_v63 = vmul.f32 %v1824_v38, %v1824_v38 }
 0x9c9   : > { %v1827_v0 = vmul.f32 %v1819_v62, %v1819_v62 }
 0x9ca   : > { %v1830_v1 = vmul.f32 %v1828_v63, %v1824_v38 }
 0x9cb   : > { %v1829_v2 = vmul.f32 %v1827_v0, %v1819_v62 }
 0x9cc   : > { %v1832_v3 = vmul.f32 0.044715, %v1830_v1 }
 0x9cd   : > { %v1831_v4 = vmul.f32 0.044715, %v1829_v2 }
 0x9ce   : > { %v1834_v5 = vadd.f32 %v1832_v3, %v1824_v38 }
 0x9cf   : > { %v1833_v6 = vadd.f32 %v1831_v4, %v1819_v62 }
 0x9d0   : > { %v1836_v7 = vmul.f32 0.7978846, %v1834_v5 }
 0x9d1   : > { %v1835_v8 = vmul.f32 0.7978846, %v1833_v6 }
 0x9d2   : > { %2525 = vtanh.f32 %v1836_v7 }
 0x9d3   : > { %2527 = vtanh.f32 %v1835_v8 }
 0x9dc   : > { %v2526_v9 = vpop.eup %2525 }
 0x9dd   : > { %v2528_v10 = vpop.eup %2527  ;;  %v1840_v11 = vadd.f32 1.0, %v2526_v9 }
 0x9de   : > { %v1839_v12 = vadd.f32 1.0, %v2528_v10 }
 0x9df   : > { %v1842_v13 = vmul.f32 0.5, %v1840_v11 }
 0x9e0   : > { %v1841_v14 = vmul.f32 0.5, %v1839_v12 }
 0x9e1   : > { %v1844_v16 = vmul.f32 %v1842_v13, %v1824_v38 }
 0x9e2   : > { %v1843_v15 = vmul.f32 %v1841_v14, %v1819_v62 }
 0x9e4   : > { %2395 = vmatprep.mubr.msk.f32.mxu0 %vm1851_vm5, %v1843_v15 }
 0x9e5   : > { %2396 = vmatmul.mubr.msk.f32.vlgmr.msra.gmra.mrb[8].mxu0 %vm1851_vm5, %v1844_v16 }
 0xab8   : > { %v2397_v18 = vpop.f32.mrb[8].mxu0 }
 0xab9   : > { %v1930_v19 = vadd.f32 %v2397_v18, %v2245_v17  ;;  %v1924_v20 = vpop.f32.mrb[9].mxu0 }
 0xaba   : > { %v1925_v37 = vadd.f32 %v2245_v17, %v1924_v20 }
 0xabb   : > { %v1934_v35 = vadd.f32 %v1930_v19, %v1739_v46 }
 0xabc   : > { %v1933_v21 = vadd.f32 %v1925_v37, %v1738_v43  ;;  %v2248_v43 = vld [vmem:[%s742_s22] ss:$0 sm:$0xff] }
 0xabd   : > { %v1938_v22 = vsel %vm836_vm1, %v1934_v35, 0.0 }
 0xabe   : > { %1939 = vadd.xlane.f32.xlu0 %v1938_v22  ;;  %v1935_v23 = vsel %vm836_vm1, %v1933_v21, 0.0 }
 0xabf   : > { %1936 = vadd.xlane.f32.xlu1 %v1935_v23 }
 0xb4b   : > { %v1940_v24 = vpop.xlane.xlu0 %1939 }
 0xb4c   : > { %v1942_v25 = vmul.f32 0.03125, %v1940_v24  ;;  %v1937_v26 = vpop.xlane.xlu1 %1936 }
 0xb4d   : > { %v1941_v27 = vmul.f32 0.03125, %v1937_v26 }
 0xb4e   : > { %v1944_v28 = vsub.f32 %v1934_v35, %v1942_v25 }
 0xb4f   : > { %v1943_v29 = vsub.f32 %v1933_v21, %v1941_v27 }
 0xb50   : > { %v1946_v30 = vmul.f32 %v1944_v28, %v1944_v28 }
 0xb51   : > { %v1945_v31 = vmul.f32 %v1943_v29, %v1943_v29 }
 0xb52   : > { %v1950_v32 = vsel %vm836_vm1, %v1946_v30, 0.0 }
 0xb53   : > { %1951 = vadd.xlane.f32.xlu0 %v1950_v32  ;;  %v1947_v33 = vsel %vm836_vm1, %v1945_v31, 0.0 }
 0xb54   : > { %1948 = vadd.xlane.f32.xlu1 %v1947_v33 }
 0xbe0   : > { %v1952_v34 = vpop.xlane.xlu0 %1951 }
 0xbe1   : > { %v1954_v36 = vmul.f32 0.03125, %v1952_v34  ;;  %v1949_v39 = vpop.xlane.xlu1 %1948 }
 0xbe2   : > { %v1953_v40 = vmul.f32 0.03125, %v1949_v39 }
 0xbe3   : > { %v1956_v41 = vadd.f32 1e-12, %v1954_v36 }
 0xbe4   : > { %v1955_v44 = vadd.f32 1e-12, %v1953_v40 }
 0xbe5   : > { %2529 = vrsqrt.f32 %v1956_v41 }
 0xbe6   : > { %2531 = vrsqrt.f32 %v1955_v44 }
 0xbef   : > { %v2530_v42 = vpop.eup %2529 }
 0xbf0   : > { %v2532_v45 = vpop.eup %2531  ;;  %v1960_v46 = vmul.f32 %v2530_v42, %v1944_v28 }
 0xbf1   : > { %v1959_v48 = vmul.f32 %v2532_v45, %v1943_v29  ;;  %1981 = sbr.rel (%p3236_p10) target bundleno = 3064 (0xbf8), region = 104 }
 0xbf2   : > { %v1968_v49 = vmul.f32 %v2248_v43, %v1960_v46 }
 0xbf3   : > { %v1967_v50 = vmul.f32 %v2248_v43, %v1959_v48 }
 0xbf4   : > { %v1976_v51 = vadd.f32 %v2249_v47, %v1968_v49 }
 0xbf5   : > { %v1975_v52 = vadd.f32 %v2249_v47, %v1967_v50 }
 0xbf6   : > { %1978 = vst.msk [vmem:[#allocation2 + $0x8] sm:$0xff] %vm836_vm1, %v1976_v51  ;;  %1983 = vst.msk [vmem:[#allocation9 + $0x8] sm:$0xff] (!%p3236_p10), %vm836_vm1, %v1976_v51 }
 0xbf7   : > { %1977 = vst.msk [vmem:[#allocation2] sm:$0xff] %vm836_vm1, %v1975_v52  ;;  %1982 = vst.msk [vmem:[#allocation9] sm:$0xff] (!%p3236_p10), %vm836_vm1, %v1975_v52 }
 0xbf8 PF: > { %p2251_p11 = scmp.ne.s32.totalorder %s2804_s27, 1 }
 0xbf9   : > { %1988 = vst.msk [vmem:[#allocation10] sm:$0xff] (!%p2251_p11), %vm836_vm1, %v1975_v52  ;;  %1989 = vst.msk [vmem:[#allocation10 + $0x8] sm:$0xff] (!%p2251_p11), %vm836_vm1, %v1976_v51 }
 0xbfa   : > { %1987 = sbr.rel (%p2251_p11) target bundleno = 3073 (0xc01), region = 108 }
 0xc01 PF: > { %p2474_p12 = scmp.eq.s32.totalorder %s2804_s27, 1  ;;  %s2704_s3 = smov [#allocation9]  }
 0xc02   : > { %s1996_s30 = sshll.u32 %s2704_s3, 4  ;;  %s1997_s30 = int_to_ptr.vmem [resolvable:$true] %s1996_s30 }
 0xc03   : > { %s2617_s22 = scalar_lea.vmem %s1997_s30, 256  ;;  %p2624_p5 = scmp.lt.s32.totalorder %s1997_s30, %s1997_s30 }
 0xc04   : > { %p2618_p13 = scmp.ne.s32.totalorder %s1997_s30, %s2617_s22  ;;  %p2625_p7 = scmp.lt.s32.totalorder %s2617_s22, %s2617_s22 }
 0xc06   : > { %p2619_p0 = pnand %p2618_p13, %p2474_p12  ;;  %p2626_p8 = por %p2625_p7, %p2624_p5 }
 0xc08   : > { %p2620_p1 = pneg %p2619_p0 }
 0xc0a   : > { %p2627_p9 = pnand %p2626_p8, %p2620_p1 }
 0xc0c   : > { %2630 = shalt.err (!%p2627_p9)
}
 0xc0d   : > { %s3237_s23 = sld [smem:[#allocation23_spill]] }
 0xc13   : > { %s2631_s18 = scalar_lea.hbm %s3237_s23, 256 }
 0xc14   : > { %p2632_p2 = scmp.ne.s32.totalorder %s3237_s23, %s2631_s18  ;;  %p2637_p6 = scmp.lt.u32.totalorder %s2631_s18, %s3237_s23 }
 0xc16   : > { %p2633_p3 = pnand %p2632_p2, %p2474_p12 }
 0xc18   : > { %p2634_p4 = pneg %p2633_p3 }
 0xc1a   : > { %p2639_p10 = pnand %p2637_p6, %p2634_p4 }
 0xc1c   : > { %2642 = shalt.err (!%p2639_p10)
}
 0xc1d   : > { %s2705_s1 = smov 128   ;;  %s2706_s26 = smov 8  }
 0xc1e   : > { %2451 = dma.vmem_to_hbm [thread:$0]  (%p2474_p12), %s1997_s30, 256, %s3237_s23, [#allocation5], %s2705_s1, %s2705_s1, %s2706_s26  }
 0xc1f   : > { %s2707_s16 = smov [#allocation10]  }
 0xc20   : > { %s2009_s19 = sshll.u32 %s2707_s16, 4  ;;  %s2010_s19 = int_to_ptr.vmem [resolvable:$true] %s2009_s19 }
 0xc21   : > { %s2643_s2 = scalar_lea.vmem %s2010_s19, 256  ;;  %p2650_p1 = scmp.lt.s32.totalorder %s2010_s19, %s2010_s19 }
 0xc22   : > { %p2644_p11 = scmp.ne.s32.totalorder %s2010_s19, %s2643_s2  ;;  %p2651_p5 = scmp.lt.s32.totalorder %s2643_s2, %s2643_s2 }
 0xc24   : > { %p2645_p13 = pnand %p2644_p11, %p2474_p12  ;;  %p2652_p7 = por %p2651_p5, %p2650_p1 }
 0xc26   : > { %p2646_p0 = pneg %p2645_p13 }
 0xc28   : > { %p2653_p8 = pnand %p2652_p7, %p2646_p0 }
 0xc2a   : > { %2656 = shalt.err (!%p2653_p8)
}
 0xc2b   : > { %s3238_s3 = sld [smem:[#allocation24_spill]] }
 0xc31   : > { %s2657_s22 = scalar_lea.hbm %s3238_s3, 256 }
 0xc32   : > { %p2658_p9 = scmp.ne.s32.totalorder %s3238_s3, %s2657_s22  ;;  %p2663_p4 = scmp.lt.u32.totalorder %s2657_s22, %s3238_s3 }
 0xc34   : > { %p2659_p2 = pnand %p2658_p9, %p2474_p12 }
 0xc36   : > { %p2660_p3 = pneg %p2659_p2 }
 0xc38   : > { %p2665_p6 = pnand %p2663_p4, %p2660_p3 }
 0xc3a   : > { %2668 = shalt.err (!%p2665_p6)
}
 0xc3b   : > { %2453 = dma.vmem_to_hbm [thread:$0]  (%p2474_p12), %s2010_s19, 256, %s3238_s3, [#allocation11], %s2705_s1, %s2705_s1, %s2706_s26  }
 0xc3c   : > { %2682 = dma.done.wait (%p2474_p12), [#allocation5], 256  }
 0xc3d   : > { %2684 = vsyncadd (%p2474_p12), [#allocation5], 4294967040 }
 0xc3e   : > { %2686 = dma.done.wait (%p2474_p12), [#allocation11], 256  }
 0xc3f   : > { %2688 = vsyncadd (%p2474_p12), [#allocation11], 4294967040 }
 0xc40 PF: > { %s3239_s4 = sld [smem:[#allocation16_spill]] }
 0xc46   : > { %s32_s24 = sadd.s32 1, %s3239_s4  }
 0xc47   : > { %p29_p10 = scmp.ge.s32.totalorder %s32_s24, 4  }
 0xc49   :  { %31 = sbr.rel (!%p29_p10) target bundleno = 13 (0xd), region = 177 }
 0xc50   :  { %2029 = vsyncpa [#allocation4], 1 }
 0xc51   :  { %2031 = vsyncpa [#allocation4 + $0x1], 1 }
 0xc52   :  { %2032 = vsyncpa [#allocation7], 1 }
 0xc53   :  { %2033 = vsyncpa [#allocation5], 1 }
 0xc54   :  { %2035 = vsyncpa [#allocation5 + $0x1], 1 }
 0xc55   :  { %2036 = vsyncpa [#allocation11], 1 }

</bundles_post_ra>
